<compile_context>
chip_gen: v7x
topology: tpu7x:2x2x1
jax: 0.10.0
libtpu: 0.0.40
codegen_flags: <defaults>
</compile_context>

<pallas_src>
import functools

import jax
import jax.numpy as jnp
from jax.experimental import pallas as pl
from jax.experimental.pallas import tpu as pltpu


def _leaky_relu(v, slope=0.01):
    return jnp.where(v >= 0, v, slope * v)


def critic_kernel(x_ref,
                  w1_ref, b1_ref,
                  w2_ref, b2_ref,
                  w3_ref, b3_ref,
                  w4_ref, b4_ref,
                  out_ref):
    # [tm, S] batch-major tile -> [S, tm] so the batch rides the lane axis
    # (small in-VMEM XLU transpose; no HBM round trip).  bf16 feeds the MXU,
    # accumulation is f32 via preferred_element_type.
    xt = x_ref[...].T.astype(jnp.bfloat16)                        # [S, tm]

    h = _leaky_relu(
        jnp.dot(w1_ref[...], xt, preferred_element_type=jnp.float32)
        + b1_ref[...])                                            # [128, tm]
    h = _leaky_relu(
        jnp.dot(w2_ref[...], h.astype(jnp.bfloat16),
                preferred_element_type=jnp.float32) + b2_ref[...])  # [256, tm]
    h = _leaky_relu(
        jnp.dot(w3_ref[...], h.astype(jnp.bfloat16),
                preferred_element_type=jnp.float32) + b3_ref[...])  # [256, tm]
    # Final layer: [1, 256] @ [256, tm] -> lane-dense [1, tm] row of values.
    out_ref[...] = (
        jnp.dot(w4_ref[...], h.astype(jnp.bfloat16),
                preferred_element_type=jnp.float32) + b4_ref[...])


@functools.partial(jax.jit, static_argnames=("tm",))
def critic_forward(state, params, tm=256):
    """state: [B, state_size]; params in PyTorch layout (W: [out,in], b: [out,1])."""
    x = state.astype(jnp.float32)
    B, S = x.shape
    tm = min(tm, B)  # single full-extent block for tiny batches

    # F.normalize(p=2, dim=0): per-feature L2 norm over the FULL batch
    # (cross-tile reduction -> wrapper), folded into W1: diag(inv) commutes
    # into the first linear layer, touching only the tiny [128, S] weight.
    norm = jnp.sqrt(jnp.sum(x * x, axis=0))
    inv_norm = 1.0 / jnp.maximum(norm, 1e-12)                      # [S]

    w1 = (params["w1"] * inv_norm[None, :]).astype(jnp.bfloat16)   # [128, S]
    w2 = params["w2"].astype(jnp.bfloat16)                         # [256, 128]
    w3 = params["w3"].astype(jnp.bfloat16)                         # [256, 256]
    w4 = params["w4"].astype(jnp.bfloat16)                         # [1, 256]
    b1, b2, b3, b4 = params["b1"], params["b2"], params["b3"], params["b4"]

    def const_spec(a):
        # Full-array block, same block every grid step -> DMA'd once, resident.
        return pl.BlockSpec(a.shape, lambda i: (0,) * a.ndim)

    flops = 2 * B * (S * 128 + 128 * 256 + 256 * 256 + 256 * 1)
    bytes_accessed = (2 * (128 * S + 128 * 256 + 256 * 256 + 256)   # bf16 weights
                      + 4 * (128 + 256 + 256 + 1)                   # f32 biases
                      + B * S * 4 + B * 4)                          # input + output

    out = pl.pallas_call(
        critic_kernel,
        out_shape=jax.ShapeDtypeStruct((1, B), jnp.float32),
        grid=(pl.cdiv(B, tm),),
        in_specs=[
            pl.BlockSpec((tm, S), lambda i: (i, 0)),   # batch tile, original layout
            const_spec(w1), const_spec(b1),
            const_spec(w2), const_spec(b2),
            const_spec(w3), const_spec(b3),
            const_spec(w4), const_spec(b4),
        ],
        out_specs=pl.BlockSpec((1, tm), lambda i: (0, i)),
        compiler_params=pltpu.CompilerParams(
            dimension_semantics=("parallel",)),
        cost_estimate=pl.CostEstimate(
            flops=flops, transcendentals=0, bytes_accessed=bytes_accessed),
    )(x, w1, b1, w2, b2, w3, b3, w4, b4)

    return out.reshape(B, 1)


def init_params(key, state_size):
    """Deterministic synthetic init matching nn.Linear (PyTorch layout).

    W stored as [out_features, in_features]; biases as [out_features, 1] columns
    so they broadcast along the lane (batch) axis inside the kernel.
    """
    sizes = [(128, state_size), (256, 128), (256, 256), (1, 256)]
    params = {}
    for idx, (fan_out, fan_in) in enumerate(sizes, start=1):
        key, kw, kb = jax.random.split(key, 3)
        bound = float(fan_in) ** -0.5
        params[f"w{idx}"] = jax.random.uniform(
            kw, (fan_out, fan_in), jnp.float32, -bound, bound)
        params[f"b{idx}"] = jax.random.uniform(
            kb, (fan_out, 1), jnp.float32, -bound, bound)
    return params


def reference_forward(state, params):
    """Pure-JAX f32 reference matching the PyTorch module."""
    x = state.astype(jnp.float32)
    x = x / jnp.maximum(jnp.linalg.norm(x, axis=0, keepdims=True), 1e-12)
    h = jax.nn.leaky_relu(x @ params["w1"].T + params["b1"].T, 0.01)
    h = jax.nn.leaky_relu(h @ params["w2"].T + params["b2"].T, 0.01)
    h = jax.nn.leaky_relu(h @ params["w3"].T + params["b3"].T, 0.01)
    return h @ params["w4"].T + params["b4"].T


if __name__ == "__main__":
    state_size = 8
    batch = 300          # not a multiple of tm -> exercises the partial last block

    key = jax.random.PRNGKey(0)
    key_x, key_p = jax.random.split(key)
    state = jax.random.normal(key_x, (batch, state_size), jnp.float32)
    params = init_params(key_p, state_size)

    value = critic_forward(state, params, tm=256)
    value = jax.block_until_ready(value)

    ref = reference_forward(state, params)
    assert value.shape == (batch, 1)
    # bf16 weights/activations with f32 accumulation -> loosened tolerance.
    assert jnp.allclose(value, ref, atol=2e-2, rtol=2e-2), (
        float(jnp.max(jnp.abs(value - ref))))

    print("KERNEL_OK")
</pallas_src>

<mosaic_0001>
module attributes {stable_mosaic.version = 11 : i64} {
  func.func @critic_kernel(%arg0: i32, %arg1: memref<256x8xf32, #tpu.memory_space<vmem>>, %arg2: memref<128x8xbf16, #tpu.memory_space<vmem>>, %arg3: memref<128x1xf32, #tpu.memory_space<vmem>>, %arg4: memref<256x128xbf16, #tpu.memory_space<vmem>>, %arg5: memref<256x1xf32, #tpu.memory_space<vmem>>, %arg6: memref<256x256xbf16, #tpu.memory_space<vmem>>, %arg7: memref<256x1xf32, #tpu.memory_space<vmem>>, %arg8: memref<1x256xbf16, #tpu.memory_space<vmem>>, %arg9: memref<1x1xf32, #tpu.memory_space<vmem>>, %arg10: memref<1x256xf32, #tpu.memory_space<vmem>>) attributes {dimension_semantics = [#tpu.dimension_semantics<parallel>], iteration_bounds = array<i64: 2>, scalar_prefetch = 0 : i64, scratch_operands = 0 : i64, tpu.core_type = #tpu.core_type<tc>, window_params = [{transform_indices = @transform_0, window_bounds = array<i64: 256, 8>}, {pipeline_mode = #tpu.pipeline_mode<synchronous>, transform_indices = @transform_1, window_bounds = array<i64: 128, 8>}, {pipeline_mode = #tpu.pipeline_mode<synchronous>, transform_indices = @transform_2, window_bounds = array<i64: 128, 1>}, {pipeline_mode = #tpu.pipeline_mode<synchronous>, transform_indices = @transform_3, window_bounds = array<i64: 256, 128>}, {pipeline_mode = #tpu.pipeline_mode<synchronous>, transform_indices = @transform_4, window_bounds = array<i64: 256, 1>}, {pipeline_mode = #tpu.pipeline_mode<synchronous>, transform_indices = @transform_5, window_bounds = array<i64: 256, 256>}, {pipeline_mode = #tpu.pipeline_mode<synchronous>, transform_indices = @transform_6, window_bounds = array<i64: 256, 1>}, {pipeline_mode = #tpu.pipeline_mode<synchronous>, transform_indices = @transform_7, window_bounds = array<i64: 1, 256>}, {pipeline_mode = #tpu.pipeline_mode<synchronous>, transform_indices = @transform_8, window_bounds = array<i64: 1, 1>}, {transform_indices = @transform_9, window_bounds = array<i64: 1, 256>}]} {
    %c0 = arith.constant 0 : index
    %c0_0 = arith.constant 0 : index
    %0 = vector.load %arg1[%c0, %c0_0] : memref<256x8xf32, #tpu.memory_space<vmem>>, vector<256x8xf32>
    %1 = tpu.transpose %0, [1, 0] : vector<256x8xf32> -> vector<8x256xf32>
    %2 = arith.truncf %1 : vector<8x256xf32> to vector<8x256xbf16>
    %c0_1 = arith.constant 0 : index
    %c0_2 = arith.constant 0 : index
    %3 = vector.load %arg2[%c0_1, %c0_2] : memref<128x8xbf16, #tpu.memory_space<vmem>>, vector<128x8xbf16>
    %cst = arith.constant dense<0.000000e+00> : vector<128x256xf32>
    %4 = tpu.matmul %3, %2, %cst {dimension_numbers = #tpu.dot_dimension_numbers<[1], [0], [0], [1], [0, 0, 1, 1], [], []>} : vector<128x8xbf16>, vector<8x256xbf16>, vector<128x256xf32> -> vector<128x256xf32>
    %c0_3 = arith.constant 0 : index
    %c0_4 = arith.constant 0 : index
    %5 = vector.load %arg3[%c0_3, %c0_4] : memref<128x1xf32, #tpu.memory_space<vmem>>, vector<128x1xf32>
    %6 = vector.broadcast %5 : vector<128x1xf32> to vector<128x256xf32>
    %7 = arith.addf %4, %6 : vector<128x256xf32>
    %cst_5 = arith.constant 0.000000e+00 : f32
    %8 = vector.broadcast %cst_5 : f32 to vector<128x256xf32>
    %9 = arith.cmpf oge, %7, %8 : vector<128x256xf32>
    %cst_6 = arith.constant 0.00999999977 : f32
    %10 = vector.broadcast %cst_6 : f32 to vector<128x256xf32>
    %11 = arith.mulf %10, %7 : vector<128x256xf32>
    %12 = arith.select %9, %7, %11 : vector<128x256xi1>, vector<128x256xf32>
    %c0_7 = arith.constant 0 : index
    %c0_8 = arith.constant 0 : index
    %13 = vector.load %arg4[%c0_7, %c0_8] : memref<256x128xbf16, #tpu.memory_space<vmem>>, vector<256x128xbf16>
    %14 = arith.truncf %12 : vector<128x256xf32> to vector<128x256xbf16>
    %cst_9 = arith.constant dense<0.000000e+00> : vector<256x256xf32>
    %15 = tpu.matmul %13, %14, %cst_9 {dimension_numbers = #tpu.dot_dimension_numbers<[1], [0], [0], [1], [0, 0, 1, 1], [], []>} : vector<256x128xbf16>, vector<128x256xbf16>, vector<256x256xf32> -> vector<256x256xf32>
    %c0_10 = arith.constant 0 : index
    %c0_11 = arith.constant 0 : index
    %16 = vector.load %arg5[%c0_10, %c0_11] : memref<256x1xf32, #tpu.memory_space<vmem>>, vector<256x1xf32>
    %17 = vector.broadcast %16 : vector<256x1xf32> to vector<256x256xf32>
    %18 = arith.addf %15, %17 : vector<256x256xf32>
    %cst_12 = arith.constant 0.000000e+00 : f32
    %19 = vector.broadcast %cst_12 : f32 to vector<256x256xf32>
    %20 = arith.cmpf oge, %18, %19 : vector<256x256xf32>
    %cst_13 = arith.constant 0.00999999977 : f32
    %21 = vector.broadcast %cst_13 : f32 to vector<256x256xf32>
    %22 = arith.mulf %21, %18 : vector<256x256xf32>
    %23 = arith.select %20, %18, %22 : vector<256x256xi1>, vector<256x256xf32>
    %c0_14 = arith.constant 0 : index
    %c0_15 = arith.constant 0 : index
    %24 = vector.load %arg6[%c0_14, %c0_15] : memref<256x256xbf16, #tpu.memory_space<vmem>>, vector<256x256xbf16>
    %25 = arith.truncf %23 : vector<256x256xf32> to vector<256x256xbf16>
    %cst_16 = arith.constant dense<0.000000e+00> : vector<256x256xf32>
    %26 = tpu.matmul %24, %25, %cst_16 {dimension_numbers = #tpu.dot_dimension_numbers<[1], [0], [0], [1], [0, 0, 1, 1], [], []>} : vector<256x256xbf16>, vector<256x256xbf16>, vector<256x256xf32> -> vector<256x256xf32>
    %c0_17 = arith.constant 0 : index
    %c0_18 = arith.constant 0 : index
    %27 = vector.load %arg7[%c0_17, %c0_18] : memref<256x1xf32, #tpu.memory_space<vmem>>, vector<256x1xf32>
    %28 = vector.broadcast %27 : vector<256x1xf32> to vector<256x256xf32>
    %29 = arith.addf %26, %28 : vector<256x256xf32>
    %cst_19 = arith.constant 0.000000e+00 : f32
    %30 = vector.broadcast %cst_19 : f32 to vector<256x256xf32>
    %31 = arith.cmpf oge, %29, %30 : vector<256x256xf32>
    %cst_20 = arith.constant 0.00999999977 : f32
    %32 = vector.broadcast %cst_20 : f32 to vector<256x256xf32>
    %33 = arith.mulf %32, %29 : vector<256x256xf32>
    %34 = arith.select %31, %29, %33 : vector<256x256xi1>, vector<256x256xf32>
    %c0_21 = arith.constant 0 : index
    %c0_22 = arith.constant 0 : index
    %35 = vector.load %arg8[%c0_21, %c0_22] : memref<1x256xbf16, #tpu.memory_space<vmem>>, vector<1x256xbf16>
    %36 = arith.truncf %34 : vector<256x256xf32> to vector<256x256xbf16>
    %cst_23 = arith.constant dense<0.000000e+00> : vector<1x256xf32>
    %37 = tpu.matmul %35, %36, %cst_23 {dimension_numbers = #tpu.dot_dimension_numbers<[1], [0], [0], [1], [0, 0, 1, 1], [], []>} : vector<1x256xbf16>, vector<256x256xbf16>, vector<1x256xf32> -> vector<1x256xf32>
    %c0_24 = arith.constant 0 : index
    %c0_25 = arith.constant 0 : index
    %38 = vector.load %arg9[%c0_24, %c0_25] : memref<1x1xf32, #tpu.memory_space<vmem>>, vector<1x1xf32>
    %39 = vector.broadcast %38 : vector<1x1xf32> to vector<1x256xf32>
    %40 = arith.addf %37, %39 : vector<1x256xf32>
    %c0_26 = arith.constant 0 : index
    %c0_27 = arith.constant 0 : index
    %41 = vector.load %arg10[%c0_26, %c0_27] : memref<1x256xf32, #tpu.memory_space<vmem>>, vector<1x256xf32>
    tpu.vector_store %arg10[%c0_26, %c0_27], %40 {strides = array<i32>} : memref<1x256xf32, #tpu.memory_space<vmem>>, vector<1x256xf32>,
    return
  }
  func.func @transform_0(%arg0: i32) -> (i32, i32) {
    %c0_i32 = arith.constant 0 : i32
    %c0_i32_0 = arith.constant 0 : i32
    return %arg0, %c0_i32 : i32, i32
  }
  func.func @transform_1(%arg0: i32) -> (i32, i32) {
    %c0_i32 = arith.constant 0 : i32
    %c0_i32_0 = arith.constant 0 : i32
    %c0_i32_1 = arith.constant 0 : i32
    return %c0_i32, %c0_i32_0 : i32, i32
  }
  func.func @transform_2(%arg0: i32) -> (i32, i32) {
    %c0_i32 = arith.constant 0 : i32
    %c0_i32_0 = arith.constant 0 : i32
    %c0_i32_1 = arith.constant 0 : i32
    return %c0_i32, %c0_i32_0 : i32, i32
  }
  func.func @transform_3(%arg0: i32) -> (i32, i32) {
    %c0_i32 = arith.constant 0 : i32
    %c0_i32_0 = arith.constant 0 : i32
    %c0_i32_1 = arith.constant 0 : i32
    return %c0_i32, %c0_i32_0 : i32, i32
  }
  func.func @transform_4(%arg0: i32) -> (i32, i32) {
    %c0_i32 = arith.constant 0 : i32
    %c0_i32_0 = arith.constant 0 : i32
    %c0_i32_1 = arith.constant 0 : i32
    return %c0_i32, %c0_i32_0 : i32, i32
  }
  func.func @transform_5(%arg0: i32) -> (i32, i32) {
    %c0_i32 = arith.constant 0 : i32
    %c0_i32_0 = arith.constant 0 : i32
    %c0_i32_1 = arith.constant 0 : i32
    return %c0_i32, %c0_i32_0 : i32, i32
  }
  func.func @transform_6(%arg0: i32) -> (i32, i32) {
    %c0_i32 = arith.constant 0 : i32
    %c0_i32_0 = arith.constant 0 : i32
    %c0_i32_1 = arith.constant 0 : i32
    return %c0_i32, %c0_i32_0 : i32, i32
  }
  func.func @transform_7(%arg0: i32) -> (i32, i32) {
    %c0_i32 = arith.constant 0 : i32
    %c0_i32_0 = arith.constant 0 : i32
    %c0_i32_1 = arith.constant 0 : i32
    return %c0_i32, %c0_i32_0 : i32, i32
  }
  func.func @transform_8(%arg0: i32) -> (i32, i32) {
    %c0_i32 = arith.constant 0 : i32
    %c0_i32_0 = arith.constant 0 : i32
    %c0_i32_1 = arith.constant 0 : i32
    return %c0_i32, %c0_i32_0 : i32, i32
  }
  func.func @transform_9(%arg0: i32) -> (i32, i32) {
    %c0_i32 = arith.constant 0 : i32
    %c0_i32_0 = arith.constant 0 : i32
    return %c0_i32, %arg0 : i32, i32
  }
}

</mosaic_0001>

<bundles_post_ra>
// kernel: critic_forward.1
= control target key start
LH: loop header
LB: loop body
LE: loop exit
PB: predicated region body
PF: predicated region fallthrough
CT: control target
= control target key end

     0   :  { %s3564_s0 = inlined_call_operand.vmem [shape: f32[300,8], index: 0, kind: input, shape index: {}]   ;;  %s3565_s1 = inlined_call_operand.vmem [shape: bf16[128,8], index: 1, kind: input, shape index: {}]   ;;  %s3566_s2 = inlined_call_operand.vmem [shape: f32[128,1], index: 2, kind: input, shape index: {}]   ;;  %s3567_s3 = inlined_call_operand.vmem [shape: bf16[256,128], index: 3, kind: input, shape index: {}]   ;;  %s3568_s4 = inlined_call_operand.vmem [shape: f32[256,1], index: 4, kind: input, shape index: {}]   ;;  %s3569_s5 = inlined_call_operand.vmem [shape: bf16[256,256], index: 5, kind: input, shape index: {}]   ;;  %s3570_s6 = inlined_call_operand.vmem [shape: f32[256,1], index: 6, kind: input, shape index: {}]   ;;  %s3571_s7 = inlined_call_operand.vmem [shape: bf16[1,256], index: 7, kind: input, shape index: {}]   ;;  %s3572_s8 = inlined_call_operand.<no memory space> [shape: f32[1,1], index: 8, kind: input, shape index: {}]   ;;  %s3573_s9 = inlined_call_operand.hbm [shape: f32[1,300], index: 9, kind: output, shape index: {}]  }
   0x1   :  { %v14_v0 = vstv %s3572_s8 }
   0x2   :  { %15 = vst [vmem:[#allocation2] sm:$0x1] %v14_v0 }
   0x3   :  { %16 = vsyncpa [#allocation4], 0 }
   0x4   :  { %18 = vsyncpa [#allocation4 + $0x1], 0  ;;  %s2937_s11 = smov 0   ;;  %s2939_s12 = smov 0  }
   0x5   :  { %s2941_s13 = smov 0   ;;  %s2943_s14 = smov 0  }
   0x6 LB: > { %s2958_s8 = sadd.s32 4294967295, %s2879_s14   ;;  %s2585_s15 = sadd.s32 4294967294, %s2879_s14   ;;  %s2879_s14 = sphi %s2943_s14, %s3579_s14   ;;  %s2875_s13 = sphi %s2941_s13, %s3578_s13   ;;  %s2871_s12 = sphi %s2939_s12, %s3577_s12   ;;  %s2867_s11 = sphi %s2937_s11, %s3576_s11  }
   0x7   : > { %s2962_s16 = sadd.s32 1, %s2879_s14   ;;  %s225_s17 = sadd.s32 1, %s2875_s13 }
   0x8   : > { %s222_s18 = ssub.s32 %s2879_s14, %s2962_s16  ;;  %p235_p0 = scmp.ne.s32.totalorder %s2875_s13, %s2871_s12 }
   0x9   : > { %p223_p1 = scmp.eq.s32.totalorder %s222_s18, 0  ;;  %p236_p2 = scmp.eq.s32.totalorder %s2958_s8, 1 }
   0xa   : > { %p241_p3 = scmp.ne.s32.totalorder %s2871_s12, %s2867_s11  ;;  %p242_p4 = scmp.eq.s32.totalorder %s2585_s15, 1 }
   0xb   : > { %s2973_s19 = scalar_select %p223_p1, %s2875_s13, %s225_s17  }
   0xc   : > { %p2975_p5 = por %p236_p2, %p235_p0  ;;  %p2979_p6 = por %p242_p4, %p241_p3 }
   0xd   : > { %p2588_p7 = scmp.ge.s32.totalorder %s2879_s14, 1  ;;  %p301_p8 = scmp.lt.s32.totalorder %s2879_s14, 3 }
   0xf   : > { %p302_p9 = pnand %p2588_p7, %p301_p8 }
  0x10   : > { %s2986_s22 = sshll.u32 (!%p302_p9), %s2958_s8, 5  ;;  %v475_v1 = vld [vmem:[%s3566_s2] sm:$0xff] (!%p302_p9)  ;;  %v2881_v2 = vmov (!%p302_p9), 0   ;;  %v476_v3 = vld [vmem:[%s3566_s2 + $0x8] sm:$0xff] (!%p302_p9)  ;;  %v477_v4 = vld [vmem:[%s3566_s2 + $0x10] sm:$0xff] (!%p302_p9)  ;;  %vm636_vm0 = vcmask (!%p302_p9), 1043456  }
  0x11   : > { %305 = sbr.rel (%p302_p9) target bundleno = 1392 (0x570), region = 56  ;;  %p346_p10 = scmp.lt.s32.totalorder (!%p302_p9), %s2986_s22, 37  ;;  %2743 = vset.pattern.permute.xlu1 (!%p302_p9), %v2881_v2  ;;  %675 = vmatprep.mubr.bf16.mxu0 (!%p302_p9), %v2881_v2  ;;  %v478_v13 = vld [vmem:[%s3566_s2 + $0x18] sm:$0xff] (!%p302_p9)  ;;  %v479_v17 = vld [vmem:[%s3566_s2 + $0x20] sm:$0xff] (!%p302_p9)  ;;  %v480_v21 = vld [vmem:[%s3566_s2 + $0x28] sm:$0xff] (!%p302_p9)  ;;  %vm611_vm1 = vcmask (!%p302_p9), 64512  }
  0x12   : > { %493 = vperm.xlu1 (!%p302_p9), %2743, %v475_v1   ;;  %1220 = vmatprep.mubr.bf16.mxu1 (!%p302_p9), %v2881_v2  ;;  %v481_v24 = vld [vmem:[%s3566_s2 + $0x30] sm:$0xff] (!%p302_p9)  ;;  %v482_v26 = vld [vmem:[%s3566_s2 + $0x38] sm:$0xff] (!%p302_p9)  ;;  %v483_v32 = vld [vmem:[%s3566_s2 + $0x40] sm:$0xff] (!%p302_p9) }
  0x13   : > { %v484_v34 = vld [vmem:[%s3566_s2 + $0x48] sm:$0xff] (!%p302_p9)  ;;  %v485_v40 = vld [vmem:[%s3566_s2 + $0x50] sm:$0xff] (!%p302_p9)  ;;  %v486_v42 = vld [vmem:[%s3566_s2 + $0x58] sm:$0xff] (!%p302_p9) }
  0x14   : > { %v487_v48 = vld [vmem:[%s3566_s2 + $0x60] sm:$0xff] (!%p302_p9)  ;;  %v488_v50 = vld [vmem:[%s3566_s2 + $0x68] sm:$0xff] (!%p302_p9)  ;;  %v489_v57 = vld [vmem:[%s3566_s2 + $0x70] sm:$0xff] (!%p302_p9) }
  0x15   : > { %v490_v61 = vld [vmem:[%s3566_s2 + $0x78] sm:$0xff] (!%p302_p9)  ;;  %v901_v1 = vld [vmem:[%s3568_s4 + $0x8] sm:$0xff] (!%p302_p9) }
  0x16   : > { %498 = vperm.xlu1 (!%p302_p9), %2743, %v476_v3  }
  0x18   : > { %s347_s25 = scalar_select %p346_p10, %s2986_s22, 37 }
  0x19   : > { %s2659_s17 = sshll.u32 (%p2975_p5), %s2958_s8, 1 }
  0x1a   : > { %s2591_s28 = sshll.u32 %s347_s25, 3  ;;  %503 = vperm.xlu1 %2743, %v477_v4   ;;  %v902_v4 = vld [vmem:[%s3568_s4 + $0x10] sm:$0xff] }
  0x1b   : > { %s3002_s10 = scalar_lea.vmem %s3564_s0, %s2591_s28  ;;  %s338_s28 = sand.u32 1, %s2871_s12  }
  0x1c   : > { %v361_v5 = vld [vmem:[%s3002_s10] sm:$0xff]  ;;  %v362_v7 = vld [vmem:[%s3002_s10 + $0x8] sm:$0xff]  ;;  %v363_v11 = vld [vmem:[%s3002_s10 + $0x10] sm:$0xff]  ;;  %s2589_s29 = sshll.u32 %s338_s28, 1  ;;  %s3510_s15 = scalar_lea.sflag [#allocation4], %s338_s28 }
  0x1d   : > { %v377_v6 = vld [vmem:[%s3002_s10 + $0x80] sm:$0xff]  ;;  %v378_v9 = vld [vmem:[%s3002_s10 + $0x88] sm:$0xff]  ;;  %v379_v12 = vld [vmem:[%s3002_s10 + $0x90] sm:$0xff]  ;;  %s340_s30 = scalar_lea.vmem [#allocation3], %s2589_s29 }
  0x1e   : > { %v2706_v8 = vpack.i.bf16 %v377_v6, %v361_v5  ;;  %v2708_v10 = vpack.i.bf16 %v378_v9, %v362_v7  ;;  %v2710_v14 = vpack.i.bf16 %v379_v12, %v363_v11  ;;  %508 = vperm.xlu1 %2743, %v478_v13   ;;  %v364_v15 = vld [vmem:[%s3002_s10 + $0x18] sm:$0xff]  ;;  %v365_v19 = vld [vmem:[%s3002_s10 + $0x20] sm:$0xff]  ;;  %v366_v23 = vld [vmem:[%s3002_s10 + $0x28] sm:$0xff] }
  0x1f   : > { %v380_v16 = vld [vmem:[%s3002_s10 + $0x98] sm:$0xff]  ;;  %v381_v20 = vld [vmem:[%s3002_s10 + $0xa0] sm:$0xff]  ;;  %v382_v25 = vld [vmem:[%s3002_s10 + $0xa8] sm:$0xff] }
  0x20   : > { %2707 = vxpose.xlu0.b32.start [1/16] (narrow) %v2706_v8, 8  ;;  %v2712_v18 = vpack.i.bf16 %v380_v16, %v364_v15  ;;  %v2714_v22 = vpack.i.bf16 %v381_v20, %v365_v19  ;;  %v2716_v27 = vpack.i.bf16 %v382_v25, %v366_v23  ;;  %v367_v28 = vld [vmem:[%s3002_s10 + $0x30] sm:$0xff]  ;;  %v368_v30 = vld [vmem:[%s3002_s10 + $0x38] sm:$0xff]  ;;  %v369_v36 = vld [vmem:[%s3002_s10 + $0x40] sm:$0xff] }
  0x21   : > { %v383_v29 = vld [vmem:[%s3002_s10 + $0xb0] sm:$0xff]  ;;  %v384_v31 = vld [vmem:[%s3002_s10 + $0xb8] sm:$0xff]  ;;  %v385_v37 = vld [vmem:[%s3002_s10 + $0xc0] sm:$0xff] }
  0x22   : > { %513 = vperm.xlu1 %2743, %v479_v17   ;;  %v2718_v33 = vpack.i.bf16 %v383_v29, %v367_v28  ;;  %v2720_v35 = vpack.i.bf16 %v384_v31, %v368_v30  ;;  %v370_v38 = vld [vmem:[%s3002_s10 + $0x48] sm:$0xff]  ;;  %v2722_v41 = vpack.i.bf16 %v385_v37, %v369_v36  ;;  %v371_v44 = vld [vmem:[%s3002_s10 + $0x50] sm:$0xff]  ;;  %v372_v46 = vld [vmem:[%s3002_s10 + $0x58] sm:$0xff] }
  0x23   : > { %v386_v39 = vld [vmem:[%s3002_s10 + $0xc8] sm:$0xff]  ;;  %v387_v45 = vld [vmem:[%s3002_s10 + $0xd0] sm:$0xff]  ;;  %v388_v47 = vld [vmem:[%s3002_s10 + $0xd8] sm:$0xff] }
  0x24   : > { %2709 = vxpose.xlu0.b32.cont [2/16] (narrow) %v2708_v10, 8  ;;  %v2724_v43 = vpack.i.bf16 %v386_v39, %v370_v38  ;;  %v2726_v49 = vpack.i.bf16 %v387_v45, %v371_v44  ;;  %v2728_v51 = vpack.i.bf16 %v388_v47, %v372_v46  ;;  %v373_v52 = vld [vmem:[%s3002_s10 + $0x60] sm:$0xff]  ;;  %v374_v55 = vld [vmem:[%s3002_s10 + $0x68] sm:$0xff]  ;;  %v375_v59 = vld [vmem:[%s3002_s10 + $0x70] sm:$0xff] }
  0x25   : > { %v389_v53 = vld [vmem:[%s3002_s10 + $0xe0] sm:$0xff]  ;;  %v390_v56 = vld [vmem:[%s3002_s10 + $0xe8] sm:$0xff]  ;;  %v391_v60 = vld [vmem:[%s3002_s10 + $0xf0] sm:$0xff] }
  0x26   : > { %518 = vperm.xlu1 %2743, %v480_v21   ;;  %v2730_v54 = vpack.i.bf16 %v389_v53, %v373_v52  ;;  %v2732_v58 = vpack.i.bf16 %v390_v56, %v374_v55  ;;  %v2734_v62 = vpack.i.bf16 %v391_v60, %v375_v59  ;;  %v376_v63 = vld [vmem:[%s3002_s10 + $0x78] sm:$0xff]  ;;  %v904_v6 = vld [vmem:[%s3568_s4 + $0x20] sm:$0xff]  ;;  %v905_v7 = vld [vmem:[%s3568_s4 + $0x28] sm:$0xff] }
  0x27   : > { %v392_v0 = vld [vmem:[%s3002_s10 + $0xf8] sm:$0xff]  ;;  %v906_v8 = vld [vmem:[%s3568_s4 + $0x30] sm:$0xff]  ;;  %v908_v10 = vld [vmem:[%s3568_s4 + $0x40] sm:$0xff]  ;;  %s2515_s10 = ssub.s32 (%p2975_p5), 3, %s2659_s17 }
  0x28   : > { %2711 = vxpose.xlu0.b32.cont [3/16] (narrow) %v2710_v14, 8  ;;  %v2736_v3 = vpack.i.bf16 %v392_v0, %v376_v63  ;;  %v903_v5 = vld [vmem:[%s3568_s4 + $0x18] sm:$0xff]  ;;  %v909_v11 = vld [vmem:[%s3568_s4 + $0x48] sm:$0xff]  ;;  %v910_v12 = vld [vmem:[%s3568_s4 + $0x50] sm:$0xff]  ;;  %p2516_p11 = scmp.lt.s32.totalorder (%p2975_p5), %s2515_s10, 2 }
  0x29   : > { %v907_v9 = vld [vmem:[%s3568_s4 + $0x38] sm:$0xff]  ;;  %v913_v14 = vld [vmem:[%s3568_s4 + $0x68] sm:$0xff]  ;;  %v2745_v29 = vld [vmem:[%s3565_s1] sm:$0xff]  }
  0x2a   : > { %523 = vperm.xlu1 %2743, %v481_v24   ;;  %v911_v13 = vld [vmem:[%s3568_s4 + $0x58] sm:$0xff]  ;;  %v917_v16 = vld [vmem:[%s3568_s4 + $0x88] sm:$0xff]  ;;  %v2751_v47 = vld [vmem:[%s3565_s1 + $0x30] sm:$0xff]  }
  0x2b   : > { %v915_v15 = vld [vmem:[%s3568_s4 + $0x78] sm:$0xff]  ;;  %v925_v20 = vld [vmem:[%s3568_s4 + $0xc8] sm:$0xff]  ;;  %v912_v59 = vld [vmem:[%s3568_s4 + $0x60] sm:$0xff] }
  0x2c   : > { %2713 = vxpose.xlu0.b32.cont [4/16] (narrow) %v2712_v18, 8  ;;  %v919_v17 = vld [vmem:[%s3568_s4 + $0x98] sm:$0xff]  ;;  %v921_v18 = vld [vmem:[%s3568_s4 + $0xa8] sm:$0xff]  ;;  %v914_v60 = vld [vmem:[%s3568_s4 + $0x70] sm:$0xff] }
  0x2d   : > { %v923_v19 = vld [vmem:[%s3568_s4 + $0xb8] sm:$0xff]  ;;  %v929_v25 = vld [vmem:[%s3568_s4 + $0xe8] sm:$0xff]  ;;  %v918_v63 = vld [vmem:[%s3568_s4 + $0x90] sm:$0xff] }
  0x2e   : > { %528 = vperm.xlu1 %2743, %v482_v26   ;;  %v927_v21 = vld [vmem:[%s3568_s4 + $0xd8] sm:$0xff]  ;;  %v1638_v31 = vld [vmem:[%s3570_s6 + $0x8] sm:$0xff] }
  0x2f   : > { %v931_v30 = vld [vmem:[%s3568_s4 + $0xf8] sm:$0xff]  ;;  %v1646_v37 = vld [vmem:[%s3570_s6 + $0x48] sm:$0xff] }
  0x30   : > { %2715 = vxpose.xlu0.b32.cont [5/16] (narrow) %v2714_v22, 8  ;;  %v1644_v36 = vld [vmem:[%s3570_s6 + $0x38] sm:$0xff]  ;;  %v2750_v44 = vld [vmem:[%s3565_s1 + $0x28] sm:$0xff]  }
  0x31   : > { %v2748_v38 = vld [vmem:[%s3565_s1 + $0x18] sm:$0xff]   ;;  %v1658_v46 = vld [vmem:[%s3570_s6 + $0xa8] sm:$0xff] }
  0x32   : > { %533 = vperm.xlu1 %2743, %v483_v32   ;;  %v2746_v32 = vld [vmem:[%s3565_s1 + $0x8] sm:$0xff]   ;;  %v1648_v39 = vld [vmem:[%s3570_s6 + $0x58] sm:$0xff] }
  0x33   : > { %v1656_v45 = vld [vmem:[%s3570_s6 + $0x98] sm:$0xff] }
  0x34   : > { %2717 = vxpose.xlu0.b32.cont [6/16] (narrow) %v2716_v27, 8  ;;  %v2752_v52 = vld [vmem:[%s3565_s1 + $0x38] sm:$0xff]  }
  0x35   : > { %v1664_v53 = vld [vmem:[%s3570_s6 + $0xd8] sm:$0xff] }
  0x36   : > { %538 = vperm.xlu1 %2743, %v484_v34   ;;  %v1642_v34 = vld [vmem:[%s3570_s6 + $0x28] sm:$0xff]  ;;  %v1668_v56 = vld [vmem:[%s3570_s6 + $0xf8] sm:$0xff] }
  0x38   : > { %2719 = vxpose.xlu0.b32.cont [7/16] (narrow) %v2718_v33, 8  ;;  %v1640_v33 = vld [vmem:[%s3570_s6 + $0x18] sm:$0xff] }
  0x3a   : > { %543 = vperm.xlu1 %2743, %v485_v40   ;;  %v1650_v40 = vld [vmem:[%s3570_s6 + $0x68] sm:$0xff] }
  0x3c   : > { %2721 = vxpose.xlu0.b32.cont [8/16] (narrow) %v2720_v35, 8  ;;  %v2747_v35 = vld [vmem:[%s3565_s1 + $0x10] sm:$0xff]  }
  0x3e   : > { %548 = vperm.xlu1 %2743, %v486_v42   ;;  %v1652_v42 = vld [vmem:[%s3570_s6 + $0x78] sm:$0xff] }
  0x40   : > { %2723 = vxpose.xlu0.b32.cont [9/16] (narrow) %v2722_v41, 8  ;;  %v2749_v41 = vld [vmem:[%s3565_s1 + $0x20] sm:$0xff]  }
  0x42   : > { %553 = vperm.xlu1 %2743, %v487_v48   ;;  %v1660_v48 = vld [vmem:[%s3570_s6 + $0xb8] sm:$0xff] }
  0x44   : > { %2725 = vxpose.xlu0.b32.cont [10/16] (narrow) %v2724_v43, 8  ;;  %v1654_v43 = vld [vmem:[%s3570_s6 + $0x88] sm:$0xff] }
  0x46   : > { %558 = vperm.xlu1 %2743, %v488_v50   ;;  %v1662_v50 = vld [vmem:[%s3570_s6 + $0xc8] sm:$0xff] }
  0x48   : > { %2727 = vxpose.xlu0.b32.cont [11/16] (narrow) %v2726_v49, 8 }
  0x4a   : > { %563 = vperm.xlu1 %2743, %v489_v57  }
  0x4c   : > { %2729 = vxpose.xlu0.b32.cont [12/16] (narrow) %v2728_v51, 8 }
  0x4e   : > { %568 = vperm.xlu1 %2743, %v490_v61   ;;  %v916_v61 = vld [vmem:[%s3568_s4 + $0x80] sm:$0xff] }
  0x50   : > { %2731 = vxpose.xlu0.b32.cont [13/16] (narrow) %v2730_v54, 8  ;;  %v1666_v54 = vld [vmem:[%s3570_s6 + $0xe8] sm:$0xff] }
  0x52   : > { %939 = vperm.xlu1 %2743, %v901_v1   ;;  %v920_v1 = vld [vmem:[%s3568_s4 + $0xa0] sm:$0xff] }
  0x54   : > { %2733 = vxpose.xlu0.b32.cont [14/16] (narrow) %v2732_v58, 8  ;;  %v900_v58 = vld [vmem:[%s3568_s4] sm:$0xff] }
  0x56   : > { %944 = vperm.xlu1 %2743, %v902_v4  }
  0x58   : > { %2735 = vxpose.xlu0.b32.cont [15/16] (narrow) %v2734_v62, 8 }
  0x5a   : > { %949 = vperm.xlu1 %2743, %v903_v5  }
  0x5c   : > { %2737 = vxpose.xlu0.b32.end [16/16] (narrow) %v2736_v3, 8 }
  0x5e   : > { %954 = vperm.xlu1 %2743, %v904_v6   ;;  %v922_v6 = vld [vmem:[%s3568_s4 + $0xb0] sm:$0xff] }
  0x62   : > { %959 = vperm.xlu1 %2743, %v905_v7  }
  0x66   : > { %964 = vperm.xlu1 %2743, %v906_v8  }
  0x6a   : > { %969 = vperm.xlu1 %2743, %v907_v9  }
  0x6e   : > { %974 = vperm.xlu1 %2743, %v908_v10  }
  0x72   : > { %979 = vperm.xlu1 %2743, %v909_v11  }
  0x76   : > { %984 = vperm.xlu1 %2743, %v910_v12  }
  0x7a   : > { %989 = vperm.xlu1 %2743, %v911_v13  }
  0x7e   : > { %999 = vperm.xlu1 %2743, %v913_v14  }
  0x82   : > { %1009 = vperm.xlu1 %2743, %v915_v15  }
  0x85   : > { %2744 = vset.pattern.permute.xlu0 %v2881_v2 }
  0x86   : > { %1019 = vperm.xlu1 %2743, %v917_v16   ;;  %934 = vperm.xlu0 %2744, %v900_v58  }
  0x8a   : > { %1029 = vperm.xlu1 %2743, %v919_v17   ;;  %994 = vperm.xlu0 %2744, %v912_v59  }
  0x8e   : > { %1039 = vperm.xlu1 %2743, %v921_v18   ;;  %1004 = vperm.xlu0 %2744, %v914_v60  }
  0x91   : > { %v494_v49 = vpop.permute.xlu1 %493 }
  0x92   : > { %1049 = vperm.xlu1 %2743, %v923_v19   ;;  %1014 = vperm.xlu0 %2744, %v916_v61   ;;  %v924_v19 = vld [vmem:[%s3568_s4 + $0xc0] sm:$0xff] }
  0x95   : > { %v499_v51 = vpop.permute.xlu1 %498 }
  0x96   : > { %1059 = vperm.xlu1 %2743, %v925_v20   ;;  %1024 = vperm.xlu0 %2744, %v918_v63  }
  0x99   : > { %v504_v55 = vpop.permute.xlu1 %503 }
  0x9a   : > { %1069 = vperm.xlu1 %2743, %v927_v21   ;;  %1034 = vperm.xlu0 %2744, %v920_v1  }
  0x9d   : > { %v509_v57 = vpop.permute.xlu1 %508 }
  0x9e   : > { %1079 = vperm.xlu1 %2743, %v929_v25   ;;  %1044 = vperm.xlu0 %2744, %v922_v6  }
  0xa0   : > { %v2738_v22 = vpop.trf.xlu0 }
  0xa1   : > { %v2742_v23 = vunpack.i.h.bf16 %v2738_v22  ;;  %v2739_v24 = vunpack.i.l.bf16 %v2738_v22  ;;  %v3241_v62 = vpop.permute.xlu1 %513 }
  0xa2   : > { %1089 = vperm.xlu1 %2743, %v931_v30   ;;  %1054 = vperm.xlu0 %2744, %v924_v19  }
  0xa3   : > { %v458_v26 = vpack.c.bf16 %v2742_v23, %v2742_v23  ;;  %v457_v27 = vpack.c.bf16 %v2739_v24, %v2739_v24 }
  0xa5   : > { %2600 = vmatprep.subr.msk.bf16.mxu0 %vm636_vm0, %v458_v26  ;;  %v638_v28 = vsel %vm636_vm0, %v457_v27, 0  ;;  %v3246_v0 = vpop.permute.xlu1 %518  ;;  %v926_v27 = vld [vmem:[%s3568_s4 + $0xd0] sm:$0xff] }
  0xa6   : > { %644 = vmatpush1.bf16.msra.mxu0 %v638_v28  ;;  %1676 = vperm.xlu1 %2743, %v1638_v31  }
  0xa7   : > { %1064 = vperm.xlu0 %2744, %v926_v27  }
  0xa9   : > { %2601 = vmatmul.mubr.msk.bf16.vlgmr.msra.gmra.mrb[0].mxu0 %vm611_vm1, %v2745_v29  ;;  %v3254_v12 = vpop.permute.xlu1 %523 }
  0xaa   : > { %685 = vmatprep.mubr.bf16.mxu0 %v2881_v2  ;;  %1686 = vperm.xlu1 %2743, %v1640_v33  }
  0xad   : > { %v3262_v28 = vpop.permute.xlu1 %528 }
  0xae   : > { %1696 = vperm.xlu1 %2743, %v1642_v34  }
  0xb1   : > { %2602 = vmatmul.mubr.msk.bf16.gmra.mrb[4].mxu0 %vm611_vm1, %v2746_v32 }
  0xb2   : > { %695 = vmatprep.mubr.bf16.mxu0 %v2881_v2  ;;  %1706 = vperm.xlu1 %2743, %v1644_v36  }
  0xb6   : > { %1716 = vperm.xlu1 %2743, %v1646_v37  }
  0xb9   : > { %2603 = vmatmul.mubr.msk.bf16.gmra.mrb[8].mxu0 %vm611_vm1, %v2747_v35 }
  0xba   : > { %705 = vmatprep.mubr.bf16.mxu0 %v2881_v2  ;;  %1726 = vperm.xlu1 %2743, %v1648_v39  }
  0xbe   : > { %1736 = vperm.xlu1 %2743, %v1650_v40   ;;  %v928_v40 = vld [vmem:[%s3568_s4 + $0xe0] sm:$0xff] }
  0xbf   : > { %1074 = vperm.xlu0 %2744, %v928_v40  }
  0xc1   : > { %2604 = vmatmul.mubr.msk.bf16.gmra.mrb[12].mxu0 %vm611_vm1, %v2748_v38 }
  0xc2   : > { %715 = vmatprep.mubr.bf16.mxu0 %v2881_v2  ;;  %1746 = vperm.xlu1 %2743, %v1652_v42  }
  0xc6   : > { %1756 = vperm.xlu1 %2743, %v1654_v43  }
  0xc9   : > { %2605 = vmatmul.mubr.msk.bf16.gmra.mrb[16].mxu0 %vm611_vm1, %v2749_v41  ;;  %v3267_v41 = vpop.permute.xlu1 %533 }
  0xca   : > { %725 = vmatprep.mubr.bf16.mxu0 %v2881_v2  ;;  %1766 = vperm.xlu1 %2743, %v1656_v45  }
  0xcd   : > { %v539_v58 = vpop.permute.xlu1 %538 }
  0xce   : > { %1776 = vperm.xlu1 %2743, %v1658_v46  }
  0xd1   : > { %2606 = vmatmul.mubr.msk.bf16.gmra.mrb[20].mxu0 %vm611_vm1, %v2750_v44 }
  0xd2   : > { %735 = vmatprep.mubr.bf16.mxu0 %v2881_v2  ;;  %1786 = vperm.xlu1 %2743, %v1660_v48  }
  0xd6   : > { %1796 = vperm.xlu1 %2743, %v1662_v50  }
  0xd9   : > { %2607 = vmatmul.mubr.msk.bf16.gmra.mrb[24].mxu0 %vm611_vm1, %v2751_v47 }
  0xda   : > { %745 = vmatprep.mubr.bf16.mxu0 %v2881_v2  ;;  %1806 = vperm.xlu1 %2743, %v1664_v53  }
  0xde   : > { %1816 = vperm.xlu1 %2743, %v1666_v54  }
  0xe1   : > { %2608 = vmatmul.mubr.msk.bf16.gmra.mrb[28].mxu0 %vm611_vm1, %v2752_v52 }
  0xe2   : > { %1826 = vperm.xlu1 %2743, %v1668_v56  }
 0x17c   : > { %v677_v3 = vpop.f32.mrb[0].mxu0 }
 0x17d   : > { %v678_v4 = vadd.f32 %v677_v3, %v494_v49  ;;  %v679_v5 = vpop.f32.mrb[1].mxu0 }
 0x17e   : > { %v680_v7 = vadd.f32 %v679_v5, %v494_v49  ;;  %v681_v8 = vpop.f32.mrb[2].mxu0  ;;  %v930_v49 = vld [vmem:[%s3568_s4 + $0xf0] sm:$0xff] }
 0x17f   : > { %v788_v9 = vmul.f32 0.01, %v678_v4  ;;  %v682_v10 = vadd.f32 %v681_v8, %v499_v51  ;;  %v683_v11 = vpop.f32.mrb[3].mxu0  ;;  %vm756_vm2 = vcmp.ge.f32.partialorder %v678_v4, 0.0  ;;  %1084 = vperm.xlu0 %2744, %v930_v49  }
 0x180   : > { %v789_v13 = vmul.f32 0.01, %v680_v7  ;;  %v684_v14 = vadd.f32 %v683_v11, %v499_v51  ;;  %vm757_vm3 = vcmp.ge.f32.partialorder %v680_v7, 0.0 }
 0x181   : > { %v790_v15 = vmul.f32 0.01, %v682_v10  ;;  %vm758_vm4 = vcmp.ge.f32.partialorder %v682_v10, 0.0  ;;  %v820_v17 = vsel %vm756_vm2, %v678_v4, %v788_v9 }
 0x182   : > { %v791_v16 = vmul.f32 0.01, %v684_v14  ;;  %vm759_vm5 = vcmp.ge.f32.partialorder %v684_v14, 0.0  ;;  %v821_v21 = vsel %vm757_vm3, %v680_v7, %v789_v13  ;;  %v1639_v7 = vld [vmem:[%s3570_s6 + $0x10] sm:$0xff] }
 0x183   : > { %v822_v18 = vsel %vm758_vm4, %v682_v10, %v790_v15 }
 0x184   : > { %v687_v20 = vpop.f32.mrb[4].mxu0  ;;  %v823_v22 = vsel %vm759_vm5, %v684_v14, %v791_v16  ;;  %v884_v23 = vpack.c.bf16 %v822_v18, %v820_v17  ;;  %v544_v14 = vpop.permute.xlu1 %543 }
 0x185   : > { %v688_v24 = vadd.f32 %v687_v20, %v504_v55  ;;  %v689_v25 = vpop.f32.mrb[5].mxu0  ;;  %v885_v26 = vpack.c.bf16 %v823_v22, %v821_v21  ;;  %v1641_v20 = vld [vmem:[%s3570_s6 + $0x20] sm:$0xff] }
 0x186   : > { %v690_v29 = vadd.f32 %v689_v25, %v504_v55  ;;  %v691_v30 = vpop.f32.mrb[6].mxu0 }
 0x187   : > { %v792_v31 = vmul.f32 0.01, %v688_v24  ;;  %v692_v32 = vadd.f32 %v691_v30, %v509_v57  ;;  %v693_v33 = vpop.f32.mrb[7].mxu0  ;;  %1188 = vmatprep.subr.bf16.mxu1 %v885_v26  ;;  %vm760_vm6 = vcmp.ge.f32.partialorder %v688_v24, 0.0 }
 0x188   : > { %v793_v34 = vmul.f32 0.01, %v690_v29  ;;  %v694_v35 = vadd.f32 %v693_v33, %v509_v57  ;;  %1189 = vmatpush1.bf16.msra.mxu1 %v884_v23  ;;  %vm761_vm7 = vcmp.ge.f32.partialorder %v690_v29, 0.0 }
 0x189   : > { %vm762_vm8 = vcmp.ge.f32.partialorder %v692_v32, 0.0  ;;  %v794_v36 = vmul.f32 0.01, %v692_v32  ;;  %v824_v38 = vsel %vm760_vm6, %v688_v24, %v792_v31 }
 0x18a   : > { %vm763_vm9 = vcmp.ge.f32.partialorder %v694_v35, 0.0  ;;  %v795_v37 = vmul.f32 0.01, %v694_v35  ;;  %v825_v43 = vsel %vm761_vm7, %v690_v29, %v793_v34  ;;  %v549_v29 = vpop.permute.xlu1 %548 }
 0x18b   : > { %v826_v39 = vsel %vm762_vm8, %v692_v32, %v794_v36 }
 0x18c   : > { %v697_v42 = vpop.f32.mrb[8].mxu0  ;;  %v827_v44 = vsel %vm763_vm9, %v694_v35, %v795_v37  ;;  %v886_v45 = vpack.c.bf16 %v826_v39, %v824_v38 }
 0x18d   : > { %v698_v46 = vadd.f32 %v697_v42, %v3241_v62  ;;  %v699_v47 = vpop.f32.mrb[9].mxu0  ;;  %v887_v48 = vpack.c.bf16 %v827_v44, %v825_v43 }
 0x18e   : > { %v700_v50 = vadd.f32 %v699_v47, %v3241_v62  ;;  %v701_v51 = vpop.f32.mrb[10].mxu0  ;;  %v1637_v62 = vld [vmem:[%s3570_s6] sm:$0xff]  ;;  %v554_v42 = vpop.permute.xlu1 %553 }
 0x18f   : > { %v796_v52 = vmul.f32 0.01, %v698_v46  ;;  %v702_v53 = vadd.f32 %v701_v51, %v3246_v0  ;;  %v703_v54 = vpop.f32.mrb[11].mxu0  ;;  %1190 = vmatprep.subr.bf16.mxu1 %v887_v48  ;;  %vm764_vm10 = vcmp.ge.f32.partialorder %v698_v46, 0.0  ;;  %1671 = vperm.xlu0 %2744, %v1637_v62  }
 0x190   : > { %v797_v55 = vmul.f32 0.01, %v700_v50  ;;  %v704_v56 = vadd.f32 %v703_v54, %v3246_v0  ;;  %1191 = vmatpush1.bf16.msra.mxu1 %v886_v45  ;;  %vm765_vm11 = vcmp.ge.f32.partialorder %v700_v50, 0.0 }
 0x191   : > { %vm766_vm12 = vcmp.ge.f32.partialorder %v702_v53, 0.0  ;;  %v798_v57 = vmul.f32 0.01, %v702_v53  ;;  %v828_v60 = vsel %vm764_vm10, %v698_v46, %v796_v52 }
 0x192   : > { %vm767_vm13 = vcmp.ge.f32.partialorder %v704_v56, 0.0  ;;  %v799_v59 = vmul.f32 0.01, %v704_v56  ;;  %v829_v1 = vsel %vm765_vm11, %v700_v50, %v797_v55  ;;  %v1647_v50 = vld [vmem:[%s3570_s6 + $0x50] sm:$0xff] }
 0x193   : > { %v830_v61 = vsel %vm766_vm12, %v702_v53, %v798_v57  ;;  %1681 = vperm.xlu0 %2744, %v1639_v7  }
 0x194   : > { %v707_v63 = vpop.f32.mrb[12].mxu0  ;;  %v831_v3 = vsel %vm767_vm13, %v704_v56, %v799_v59  ;;  %v888_v4 = vpack.c.bf16 %v830_v61, %v828_v60  ;;  %v559_v59 = vpop.permute.xlu1 %558 }
 0x195   : > { %v708_v0 = vadd.f32 %v707_v63, %v3254_v12  ;;  %v709_v5 = vpop.f32.mrb[13].mxu0  ;;  %v889_v6 = vpack.c.bf16 %v831_v3, %v829_v1  ;;  %v1649_v63 = vld [vmem:[%s3570_s6 + $0x60] sm:$0xff] }
 0x196   : > { %v710_v8 = vadd.f32 %v709_v5, %v3254_v12  ;;  %v711_v9 = vpop.f32.mrb[14].mxu0 }
 0x197   : > { %v800_v10 = vmul.f32 0.01, %v708_v0  ;;  %v712_v11 = vadd.f32 %v711_v9, %v3262_v28  ;;  %v713_v13 = vpop.f32.mrb[15].mxu0  ;;  %1192 = vmatprep.subr.bf16.mxu1 %v889_v6  ;;  %vm768_vm14 = vcmp.ge.f32.partialorder %v708_v0, 0.0  ;;  %1691 = vperm.xlu0 %2744, %v1641_v20  }
 0x198   : > { %v801_v15 = vmul.f32 0.01, %v710_v8  ;;  %v714_v16 = vadd.f32 %v713_v13, %v3262_v28  ;;  %1193 = vmatpush1.bf16.msra.mxu1 %v888_v4  ;;  %vm769_vm15 = vcmp.ge.f32.partialorder %v710_v8, 0.0  ;;  %v1643_v28 = vld [vmem:[%s3570_s6 + $0x30] sm:$0xff] }
 0x199   : > { %vm770_vm0 = vcmp.ge.f32.partialorder %v712_v11, 0.0  ;;  %v802_v17 = vmul.f32 0.01, %v712_v11  ;;  %v832_v19 = vsel %vm768_vm14, %v708_v0, %v800_v10 }
 0x19a   : > { %vm771_vm1 = vcmp.ge.f32.partialorder %v714_v16, 0.0  ;;  %v803_v18 = vmul.f32 0.01, %v714_v16  ;;  %v833_v22 = vsel %vm769_vm15, %v710_v8, %v801_v15  ;;  %v1651_v8 = vld [vmem:[%s3570_s6 + $0x70] sm:$0xff]  ;;  %v564_v15 = vpop.permute.xlu1 %563 }
 0x19b   : > { %v834_v12 = vsel %vm770_vm0, %v712_v11, %v802_v17  ;;  %1701 = vperm.xlu0 %2744, %v1643_v28  }
 0x19c   : > { %v717_v21 = vpop.f32.mrb[16].mxu0  ;;  %v835_v23 = vsel %vm771_vm1, %v714_v16, %v803_v18  ;;  %v890_v24 = vpack.c.bf16 %v834_v12, %v832_v19 }
 0x19d   : > { %v718_v25 = vadd.f32 %v717_v21, %v3267_v41  ;;  %v719_v26 = vpop.f32.mrb[17].mxu0  ;;  %v891_v27 = vpack.c.bf16 %v835_v23, %v833_v22  ;;  %v1653_v21 = vld [vmem:[%s3570_s6 + $0x80] sm:$0xff] }
 0x19e   : > { %v720_v30 = vadd.f32 %v719_v26, %v3267_v41  ;;  %v721_v31 = vpop.f32.mrb[18].mxu0  ;;  %v1645_v41 = vld [vmem:[%s3570_s6 + $0x40] sm:$0xff] }
 0x19f   : > { %v804_v32 = vmul.f32 0.01, %v718_v25  ;;  %v722_v33 = vadd.f32 %v721_v31, %v539_v58  ;;  %v723_v34 = vpop.f32.mrb[19].mxu0  ;;  %1194 = vmatprep.subr.bf16.mxu1 %v891_v27  ;;  %vm772_vm2 = vcmp.ge.f32.partialorder %v718_v25, 0.0  ;;  %1711 = vperm.xlu0 %2744, %v1645_v41  }
 0x1a0   : > { %v805_v35 = vmul.f32 0.01, %v720_v30  ;;  %v724_v36 = vadd.f32 %v723_v34, %v539_v58  ;;  %1195 = vmatpush1.bf16.msra.mxu1 %v890_v24  ;;  %vm773_vm3 = vcmp.ge.f32.partialorder %v720_v30, 0.0 }
 0x1a1   : > { %vm774_vm4 = vcmp.ge.f32.partialorder %v722_v33, 0.0  ;;  %v806_v37 = vmul.f32 0.01, %v722_v33  ;;  %v836_v39 = vsel %vm772_vm2, %v718_v25, %v804_v32 }
 0x1a2   : > { %vm775_vm5 = vcmp.ge.f32.partialorder %v724_v36, 0.0  ;;  %v807_v38 = vmul.f32 0.01, %v724_v36  ;;  %v837_v44 = vsel %vm773_vm3, %v720_v30, %v805_v35  ;;  %v569_v30 = vpop.permute.xlu1 %568 }
 0x1a3   : > { %v838_v40 = vsel %vm774_vm4, %v722_v33, %v806_v37  ;;  %1721 = vperm.xlu0 %2744, %v1647_v50   ;;  %v1663_v50 = vld [vmem:[%s3570_s6 + $0xd0] sm:$0xff] }
 0x1a4   : > { %v727_v43 = vpop.f32.mrb[20].mxu0  ;;  %v839_v45 = vsel %vm775_vm5, %v724_v36, %v807_v38  ;;  %v892_v46 = vpack.c.bf16 %v838_v40, %v836_v39 }
 0x1a5   : > { %v728_v47 = vadd.f32 %v727_v43, %v544_v14  ;;  %v729_v48 = vpop.f32.mrb[21].mxu0  ;;  %v893_v49 = vpack.c.bf16 %v839_v45, %v837_v44 }
 0x1a6   : > { %v730_v51 = vadd.f32 %v729_v48, %v544_v14  ;;  %v731_v52 = vpop.f32.mrb[22].mxu0  ;;  %v2753_v48 = vld [vmem:[%s3567_s3] sm:$0xff]  }
 0x1a7   : > { %v808_v53 = vmul.f32 0.01, %v728_v47  ;;  %v732_v54 = vadd.f32 %v731_v52, %v549_v29  ;;  %v733_v55 = vpop.f32.mrb[23].mxu0  ;;  %1196 = vmatprep.subr.bf16.mxu1 %v893_v49  ;;  %vm776_vm6 = vcmp.ge.f32.partialorder %v728_v47, 0.0  ;;  %1731 = vperm.xlu0 %2744, %v1649_v63   ;;  %v1661_v49 = vld [vmem:[%s3570_s6 + $0xc0] sm:$0xff]  ;;  %v2763_v63 = vld [vmem:[%s3567_s3 + $0x50] sm:$0xff]  }
 0x1a8   : > { %v809_v56 = vmul.f32 0.01, %v730_v51  ;;  %v734_v57 = vadd.f32 %v733_v55, %v549_v29  ;;  %1197 = vmatpush1.bf16.msra.mxu1 %v892_v46  ;;  %vm777_vm7 = vcmp.ge.f32.partialorder %v730_v51, 0.0  ;;  %v1655_v29 = vld [vmem:[%s3570_s6 + $0x90] sm:$0xff]  ;;  %v1665_v52 = vld [vmem:[%s3570_s6 + $0xe0] sm:$0xff] }
 0x1a9   : > { %vm778_vm8 = vcmp.ge.f32.partialorder %v732_v54, 0.0  ;;  %v810_v58 = vmul.f32 0.01, %v732_v54  ;;  %v840_v61 = vsel %vm776_vm6, %v728_v47, %v808_v53  ;;  %v1659_v47 = vld [vmem:[%s3570_s6 + $0xb0] sm:$0xff]  ;;  %v2407_v55 = vld [vmem:[#allocation2] sm:$0x1] }
 0x1aa   : > { %vm779_vm9 = vcmp.ge.f32.partialorder %v734_v57, 0.0  ;;  %v811_v60 = vmul.f32 0.01, %v734_v57  ;;  %v841_v3 = vsel %vm777_vm7, %v730_v51, %v809_v56  ;;  %v2754_v51 = vld [vmem:[%s3567_s3 + $0x8] sm:$0xff]   ;;  %v1667_v53 = vld [vmem:[%s3570_s6 + $0xf0] sm:$0xff]  ;;  %v2756_v56 = vld [vmem:[%s3567_s3 + $0x18] sm:$0xff]  }
 0x1ab   : > { %v842_v62 = vsel %vm778_vm8, %v732_v54, %v810_v58  ;;  %1741 = vperm.xlu0 %2744, %v1651_v8   ;;  %v2755_v54 = vld [vmem:[%s3567_s3 + $0x10] sm:$0xff]   ;;  %v2758_v58 = vld [vmem:[%s3567_s3 + $0x28] sm:$0xff]  }
 0x1ac   : > { %v737_v1 = vpop.f32.mrb[24].mxu0  ;;  %v843_v4 = vsel %vm779_vm9, %v734_v57, %v811_v60  ;;  %v894_v0 = vpack.c.bf16 %v842_v62, %v840_v61  ;;  %v2757_v57 = vld [vmem:[%s3567_s3 + $0x20] sm:$0xff]   ;;  %v2760_v60 = vld [vmem:[%s3567_s3 + $0x38] sm:$0xff]   ;;  %v2762_v62 = vld [vmem:[%s3567_s3 + $0x48] sm:$0xff]  }
 0x1ad   : > { %v738_v5 = vadd.f32 %v737_v1, %v554_v42  ;;  %v739_v6 = vpop.f32.mrb[25].mxu0  ;;  %v895_v7 = vpack.c.bf16 %v843_v4, %v841_v3  ;;  %v2761_v61 = vld [vmem:[%s3567_s3 + $0x40] sm:$0xff]   ;;  %v2764_v1 = vld [vmem:[%s3567_s3 + $0x58] sm:$0xff]   ;;  %v2766_v4 = vld [vmem:[%s3567_s3 + $0x68] sm:$0xff]  }
 0x1ae   : > { %v740_v9 = vadd.f32 %v739_v6, %v554_v42  ;;  %v741_v10 = vpop.f32.mrb[26].mxu0  ;;  %v1657_v42 = vld [vmem:[%s3570_s6 + $0xa0] sm:$0xff]  ;;  %v940_v6 = vpop.permute.xlu1 %939 }
 0x1af   : > { %v812_v11 = vmul.f32 0.01, %v738_v5  ;;  %v742_v13 = vadd.f32 %v741_v10, %v559_v59  ;;  %v743_v14 = vpop.f32.mrb[27].mxu0  ;;  %1198 = vmatprep.subr.bf16.mxu1 %v895_v7  ;;  %vm780_vm10 = vcmp.ge.f32.partialorder %v738_v5, 0.0  ;;  %1751 = vperm.xlu0 %2744, %v1653_v21   ;;  %v2765_v3 = vld [vmem:[%s3567_s3 + $0x60] sm:$0xff]   ;;  %v935_v10 = vpop.permute.xlu0 %934 }
 0x1b0   : > { %v813_v16 = vmul.f32 0.01, %v740_v9  ;;  %v744_v17 = vadd.f32 %v743_v14, %v559_v59  ;;  %1199 = vmatpush1.bf16.msra.mxu1 %v894_v0  ;;  %vm781_vm11 = vcmp.ge.f32.partialorder %v740_v9, 0.0  ;;  %v2759_v59 = vld [vmem:[%s3567_s3 + $0x30] sm:$0xff]   ;;  %v2771_v21 = vld [vmem:[%s3569_s5 + $0x4] ss:$8 sps:$4 sm:$0xff]  }
 0x1b1   : > { %vm782_vm12 = vcmp.ge.f32.partialorder %v742_v13, 0.0  ;;  %v814_v18 = vmul.f32 0.01, %v742_v13  ;;  %v844_v12 = vsel %vm780_vm10, %v738_v5, %v812_v11  ;;  %v2767_v0 = vld [vmem:[%s3567_s3 + $0x70] sm:$0xff]   ;;  %v2768_v5 = vld [vmem:[%s3567_s3 + $0x78] sm:$0xff]   ;;  %2021 = vmatprep.mubr.bf16.mxu0 %v2771_v21 }
 0x1b2   : > { %vm783_vm13 = vcmp.ge.f32.partialorder %v744_v17, 0.0  ;;  %v815_v19 = vmul.f32 0.01, %v744_v17  ;;  %v845_v23 = vsel %vm781_vm11, %v740_v9, %v813_v16  ;;  %v945_v7 = vpop.permute.xlu1 %944 }
 0x1b3   : > { %v846_v20 = vsel %vm782_vm12, %v742_v13, %v814_v18  ;;  %1761 = vperm.xlu0 %2744, %v1655_v29  }
 0x1b4   : > { %v747_v22 = vpop.f32.mrb[28].mxu0  ;;  %v847_v24 = vsel %vm783_vm13, %v744_v17, %v815_v19  ;;  %v896_v25 = vpack.c.bf16 %v846_v20, %v844_v12 }
 0x1b5   : > { %v748_v26 = vadd.f32 %v747_v22, %v564_v15  ;;  %v749_v27 = vpop.f32.mrb[29].mxu0  ;;  %v897_v28 = vpack.c.bf16 %v847_v24, %v845_v23 }
 0x1b6   : > { %v750_v31 = vadd.f32 %v749_v27, %v564_v15  ;;  %v751_v32 = vpop.f32.mrb[30].mxu0  ;;  %v950_v8 = vpop.permute.xlu1 %949 }
 0x1b7   : > { %v816_v33 = vmul.f32 0.01, %v748_v26  ;;  %v752_v34 = vadd.f32 %v751_v32, %v569_v30  ;;  %v753_v35 = vpop.f32.mrb[31].mxu0  ;;  %1200 = vmatprep.subr.bf16.mxu1 %v897_v28  ;;  %vm784_vm14 = vcmp.ge.f32.partialorder %v748_v26, 0.0  ;;  %1771 = vperm.xlu0 %2744, %v1657_v42  }
 0x1b8   : > { %v817_v36 = vmul.f32 0.01, %v750_v31  ;;  %v754_v37 = vadd.f32 %v753_v35, %v569_v30  ;;  %1201 = vmatpush1.bf16.msra.mxu1 %v896_v25  ;;  %vm785_vm15 = vcmp.ge.f32.partialorder %v750_v31, 0.0 }
 0x1b9   : > { %vm786_vm0 = vcmp.ge.f32.partialorder %v752_v34, 0.0  ;;  %v818_v38 = vmul.f32 0.01, %v752_v34  ;;  %v848_v40 = vsel %vm784_vm14, %v748_v26, %v816_v33 }
 0x1ba   : > { %vm787_vm1 = vcmp.ge.f32.partialorder %v754_v37, 0.0  ;;  %v819_v39 = vmul.f32 0.01, %v754_v37  ;;  %v849_v43 = vsel %vm785_vm15, %v750_v31, %v817_v36  ;;  %v955_v9 = vpop.permute.xlu1 %954 }
 0x1bb   : > { %v850_v41 = vsel %vm786_vm0, %v752_v34, %v818_v38  ;;  %1781 = vperm.xlu0 %2744, %v1659_v47  }
 0x1bc   : > { %v851_v44 = vsel %vm787_vm1, %v754_v37, %v819_v39  ;;  %v898_v45 = vpack.c.bf16 %v850_v41, %v848_v40 }
 0x1bd   : > { %v899_v46 = vpack.c.bf16 %v851_v44, %v849_v43 }
 0x1be   : > { %v960_v22 = vpop.permute.xlu1 %959 }
 0x1bf   : > { %1202 = vmatprep.subr.bf16.mxu1 %v899_v46  ;;  %1791 = vperm.xlu0 %2744, %v1661_v49  }
 0x1c0   : > { %1203 = vmatpush1.bf16.msra.mxu1 %v898_v45 }
 0x1c2   : > { %v965_v38 = vpop.permute.xlu1 %964 }
 0x1c3   : > { %1221 = vmatmul.mubr.bf16.vlgmr.msra.gmra.mrb[0].mxu1 %v2753_v48  ;;  %1801 = vperm.xlu0 %2744, %v1663_v50  }
 0x1c4   : > { %1230 = vmatprep.mubr.bf16.mxu1 %v2881_v2 }
 0x1c7   : > { %1811 = vperm.xlu0 %2744, %v1665_v52   ;;  %v970_v52 = vpop.permute.xlu1 %969 }
 0x1cb   : > { %1231 = vmatmul.mubr.bf16.gmra.mrb[4].mxu1 %v2754_v51  ;;  %1821 = vperm.xlu0 %2744, %v1667_v53  }
 0x1cc   : > { %1240 = vmatprep.mubr.bf16.mxu1 %v2881_v2 }
 0x1cf   : > { %2410 = vperm.xlu0 %2744, %v2407_v55  }
 0x1d3   : > { %1241 = vmatmul.mubr.bf16.gmra.mrb[8].mxu1 %v2755_v54 }
 0x1d4   : > { %1250 = vmatprep.mubr.bf16.mxu1 %v2881_v2 }
 0x1db   : > { %1251 = vmatmul.mubr.bf16.gmra.mrb[12].mxu1 %v2756_v56 }
 0x1dc   : > { %1260 = vmatprep.mubr.bf16.mxu1 %v2881_v2 }
 0x1e3   : > { %1261 = vmatmul.mubr.bf16.gmra.mrb[16].mxu1 %v2757_v57 }
 0x1e4   : > { %1270 = vmatprep.mubr.bf16.mxu1 %v2881_v2 }
 0x1eb   : > { %1271 = vmatmul.mubr.bf16.gmra.mrb[20].mxu1 %v2758_v58 }
 0x1ec   : > { %1280 = vmatprep.mubr.bf16.mxu1 %v2881_v2 }
 0x1f3   : > { %1281 = vmatmul.mubr.bf16.gmra.mrb[24].mxu1 %v2759_v59 }
 0x1f4   : > { %1290 = vmatprep.mubr.bf16.mxu1 %v2881_v2 }
 0x1fb   : > { %1291 = vmatmul.mubr.bf16.gmra.mrb[28].mxu1 %v2760_v60 }
 0x1fc   : > { %1300 = vmatprep.mubr.bf16.mxu1 %v2881_v2 }
 0x203   : > { %1301 = vmatmul.mubr.bf16.gmra.mrb[32].mxu1 %v2761_v61 }
 0x204   : > { %1310 = vmatprep.mubr.bf16.mxu1 %v2881_v2 }
 0x20b   : > { %1311 = vmatmul.mubr.bf16.gmra.mrb[36].mxu1 %v2762_v62 }
 0x20c   : > { %1320 = vmatprep.mubr.bf16.mxu1 %v2881_v2 }
 0x213   : > { %1321 = vmatmul.mubr.bf16.gmra.mrb[40].mxu1 %v2763_v63 }
 0x214   : > { %1330 = vmatprep.mubr.bf16.mxu1 %v2881_v2 }
 0x21b   : > { %1331 = vmatmul.mubr.bf16.gmra.mrb[44].mxu1 %v2764_v1  ;;  %v975_v1 = vpop.permute.xlu1 %974 }
 0x21c   : > { %1340 = vmatprep.mubr.bf16.mxu1 %v2881_v2 }
 0x223   : > { %1341 = vmatmul.mubr.bf16.gmra.mrb[48].mxu1 %v2765_v3 }
 0x224   : > { %1350 = vmatprep.mubr.bf16.mxu1 %v2881_v2 }
 0x22b   : > { %1351 = vmatmul.mubr.bf16.gmra.mrb[52].mxu1 %v2766_v4 }
 0x22c   : > { %1360 = vmatprep.mubr.bf16.mxu1 %v2881_v2 }
 0x233   : > { %1361 = vmatmul.mubr.bf16.gmra.mrb[56].mxu1 %v2767_v0 }
 0x234   : > { %1370 = vmatprep.mubr.bf16.mxu1 %v2881_v2 }
 0x23b   : > { %1371 = vmatmul.mubr.bf16.gmra.mrb[60].mxu1 %v2768_v5 }
 0x296   : > { %v1222_v11 = vpop.f32.mrb[0].mxu1 }
 0x297   : > { %v1223_v13 = vadd.f32 %v1222_v11, %v935_v10  ;;  %v1224_v14 = vpop.f32.mrb[1].mxu1 }
 0x298   : > { %v1225_v15 = vadd.f32 %v1224_v14, %v935_v10  ;;  %v1226_v16 = vpop.f32.mrb[2].mxu1 }
 0x299   : > { %v1445_v17 = vmul.f32 0.01, %v1223_v13  ;;  %v1227_v18 = vadd.f32 %v1226_v16, %v940_v6  ;;  %v1228_v19 = vpop.f32.mrb[3].mxu1  ;;  %vm1381_vm2 = vcmp.ge.f32.partialorder %v1223_v13, 0.0 }
 0x29a   : > { %v1446_v2 = vmul.f32 0.01, %v1225_v15  ;;  %v1229_v12 = vadd.f32 %v1228_v19, %v940_v6  ;;  %vm1382_vm3 = vcmp.ge.f32.partialorder %v1225_v15, 0.0 }
 0x29b   : > { %vm1383_vm4 = vcmp.ge.f32.partialorder %v1227_v18, 0.0  ;;  %v1447_v20 = vmul.f32 0.01, %v1227_v18  ;;  %v1509_v24 = vsel %vm1381_vm2, %v1223_v13, %v1445_v17 }
 0x29c   : > { %vm1384_vm5 = vcmp.ge.f32.partialorder %v1229_v12, 0.0  ;;  %v1448_v23 = vmul.f32 0.01, %v1229_v12  ;;  %v1510_v28 = vsel %vm1382_vm3, %v1225_v15, %v1446_v2 }
 0x29d   : > { %v1511_v25 = vsel %vm1383_vm4, %v1227_v18, %v1447_v20  ;;  %v980_v18 = vpop.permute.xlu1 %979 }
 0x29e   : > { %v1605_v26 = vpack.c.bf16 %v1511_v25, %v1509_v24  ;;  %v1232_v27 = vpop.f32.mrb[4].mxu1  ;;  %v1512_v29 = vsel %vm1384_vm5, %v1229_v12, %v1448_v23 }
 0x29f   : > { %v1233_v30 = vadd.f32 %v1232_v27, %v945_v7  ;;  %v1234_v31 = vpop.f32.mrb[5].mxu1  ;;  %v1606_v32 = vpack.c.bf16 %v1512_v29, %v1510_v28 }
 0x2a0   : > { %v1235_v33 = vadd.f32 %v1234_v31, %v945_v7  ;;  %v1236_v34 = vpop.f32.mrb[6].mxu1 }
 0x2a1   : > { %v1449_v35 = vmul.f32 0.01, %v1233_v30  ;;  %v1237_v36 = vadd.f32 %v1236_v34, %v950_v8  ;;  %v1238_v37 = vpop.f32.mrb[7].mxu1  ;;  %1989 = vmatprep.subr.bf16.mxu0 %v1606_v32  ;;  %vm1385_vm6 = vcmp.ge.f32.partialorder %v1233_v30, 0.0  ;;  %v985_v32 = vpop.permute.xlu1 %984 }
 0x2a2   : > { %v1450_v39 = vmul.f32 0.01, %v1235_v33  ;;  %v1239_v40 = vadd.f32 %v1238_v37, %v950_v8  ;;  %1990 = vmatpush1.bf16.msra.mxu0 %v1605_v26  ;;  %vm1386_vm7 = vcmp.ge.f32.partialorder %v1235_v33, 0.0 }
 0x2a3   : > { %vm1387_vm8 = vcmp.ge.f32.partialorder %v1237_v36, 0.0  ;;  %v1451_v41 = vmul.f32 0.01, %v1237_v36  ;;  %v1513_v43 = vsel %vm1385_vm6, %v1233_v30, %v1449_v35 }
 0x2a4   : > { %vm1388_vm9 = vcmp.ge.f32.partialorder %v1239_v40, 0.0  ;;  %v1452_v42 = vmul.f32 0.01, %v1239_v40  ;;  %v1514_v47 = vsel %vm1386_vm7, %v1235_v33, %v1450_v39 }
 0x2a5   : > { %v1515_v44 = vsel %vm1387_vm8, %v1237_v36, %v1451_v41 }
 0x2a6   : > { %v1607_v45 = vpack.c.bf16 %v1515_v44, %v1513_v43  ;;  %v1242_v46 = vpop.f32.mrb[8].mxu1  ;;  %v1516_v48 = vsel %vm1388_vm9, %v1239_v40, %v1452_v42 }
 0x2a7   : > { %v1243_v49 = vadd.f32 %v1242_v46, %v955_v9  ;;  %v1244_v50 = vpop.f32.mrb[9].mxu1  ;;  %v1608_v51 = vpack.c.bf16 %v1516_v48, %v1514_v47  ;;  %v990_v46 = vpop.permute.xlu1 %989 }
 0x2a8   : > { %v1245_v53 = vadd.f32 %v1244_v50, %v955_v9  ;;  %v1246_v54 = vpop.f32.mrb[10].mxu1 }
 0x2a9   : > { %v1453_v55 = vmul.f32 0.01, %v1243_v49  ;;  %v1247_v56 = vadd.f32 %v1246_v54, %v960_v22  ;;  %v1248_v57 = vpop.f32.mrb[11].mxu1  ;;  %1991 = vmatprep.subr.bf16.mxu0 %v1608_v51  ;;  %vm1389_vm10 = vcmp.ge.f32.partialorder %v1243_v49, 0.0 }
 0x2aa   : > { %v1454_v58 = vmul.f32 0.01, %v1245_v53  ;;  %v1249_v59 = vadd.f32 %v1248_v57, %v960_v22  ;;  %1992 = vmatpush1.bf16.msra.mxu0 %v1607_v45  ;;  %vm1390_vm11 = vcmp.ge.f32.partialorder %v1245_v53, 0.0 }
 0x2ab   : > { %vm1391_vm12 = vcmp.ge.f32.partialorder %v1247_v56, 0.0  ;;  %v1455_v60 = vmul.f32 0.01, %v1247_v56  ;;  %v1517_v62 = vsel %vm1389_vm10, %v1243_v49, %v1453_v55 }
 0x2ac   : > { %vm1392_vm13 = vcmp.ge.f32.partialorder %v1249_v59, 0.0  ;;  %v1456_v61 = vmul.f32 0.01, %v1249_v59  ;;  %v1518_v0 = vsel %vm1390_vm11, %v1245_v53, %v1454_v58  ;;  %v995_v58 = vpop.permute.xlu0 %994 }
 0x2ad   : > { %v1519_v63 = vsel %vm1391_vm12, %v1247_v56, %v1455_v60 }
 0x2ae   : > { %v1609_v3 = vpack.c.bf16 %v1519_v63, %v1517_v62  ;;  %v1252_v4 = vpop.f32.mrb[12].mxu1  ;;  %v1520_v5 = vsel %vm1392_vm13, %v1249_v59, %v1456_v61 }
 0x2af   : > { %v1253_v6 = vadd.f32 %v1252_v4, %v965_v38  ;;  %v1254_v7 = vpop.f32.mrb[13].mxu1  ;;  %v1610_v8 = vpack.c.bf16 %v1520_v5, %v1518_v0  ;;  %v1000_v4 = vpop.permute.xlu1 %999 }
 0x2b0   : > { %v1255_v9 = vadd.f32 %v1254_v7, %v965_v38  ;;  %v1256_v10 = vpop.f32.mrb[14].mxu1 }
 0x2b1   : > { %v1457_v11 = vmul.f32 0.01, %v1253_v6  ;;  %v1257_v13 = vadd.f32 %v1256_v10, %v970_v52  ;;  %v1258_v14 = vpop.f32.mrb[15].mxu1  ;;  %1993 = vmatprep.subr.bf16.mxu0 %v1610_v8  ;;  %vm1393_vm14 = vcmp.ge.f32.partialorder %v1253_v6, 0.0 }
 0x2b2   : > { %v1458_v15 = vmul.f32 0.01, %v1255_v9  ;;  %v1259_v16 = vadd.f32 %v1258_v14, %v970_v52  ;;  %1994 = vmatpush1.bf16.msra.mxu0 %v1609_v3  ;;  %vm1394_vm15 = vcmp.ge.f32.partialorder %v1255_v9, 0.0 }
 0x2b3   : > { %vm1395_vm0 = vcmp.ge.f32.partialorder %v1257_v13, 0.0  ;;  %v1459_v17 = vmul.f32 0.01, %v1257_v13  ;;  %v1521_v2 = vsel %vm1393_vm14, %v1253_v6, %v1457_v11 }
 0x2b4   : > { %vm1396_vm1 = vcmp.ge.f32.partialorder %v1259_v16, 0.0  ;;  %v1460_v19 = vmul.f32 0.01, %v1259_v16  ;;  %v1522_v22 = vsel %vm1394_vm15, %v1255_v9, %v1458_v15 }
 0x2b5   : > { %v1523_v12 = vsel %vm1395_vm0, %v1257_v13, %v1459_v17 }
 0x2b6   : > { %v1611_v20 = vpack.c.bf16 %v1523_v12, %v1521_v2  ;;  %v1262_v21 = vpop.f32.mrb[16].mxu1  ;;  %v1524_v23 = vsel %vm1396_vm1, %v1259_v16, %v1460_v19  ;;  %v1005_v16 = vpop.permute.xlu0 %1004 }
 0x2b7   : > { %v1263_v24 = vadd.f32 %v1262_v21, %v975_v1  ;;  %v1264_v25 = vpop.f32.mrb[17].mxu1  ;;  %v1612_v26 = vpack.c.bf16 %v1524_v23, %v1522_v22  ;;  %v1010_v22 = vpop.permute.xlu1 %1009 }
 0x2b8   : > { %v1265_v27 = vadd.f32 %v1264_v25, %v975_v1  ;;  %v1266_v28 = vpop.f32.mrb[18].mxu1 }
 0x2b9   : > { %v1461_v29 = vmul.f32 0.01, %v1263_v24  ;;  %v1267_v30 = vadd.f32 %v1266_v28, %v980_v18  ;;  %v1268_v31 = vpop.f32.mrb[19].mxu1  ;;  %1995 = vmatprep.subr.bf16.mxu0 %v1612_v26  ;;  %vm1397_vm2 = vcmp.ge.f32.partialorder %v1263_v24, 0.0 }
 0x2ba   : > { %v1462_v33 = vmul.f32 0.01, %v1265_v27  ;;  %v1269_v34 = vadd.f32 %v1268_v31, %v980_v18  ;;  %1996 = vmatpush1.bf16.msra.mxu0 %v1611_v20  ;;  %vm1398_vm3 = vcmp.ge.f32.partialorder %v1265_v27, 0.0 }
 0x2bb   : > { %vm1399_vm4 = vcmp.ge.f32.partialorder %v1267_v30, 0.0  ;;  %v1463_v35 = vmul.f32 0.01, %v1267_v30  ;;  %v1525_v37 = vsel %vm1397_vm2, %v1263_v24, %v1461_v29 }
 0x2bc   : > { %vm1400_vm5 = vcmp.ge.f32.partialorder %v1269_v34, 0.0  ;;  %v1464_v36 = vmul.f32 0.01, %v1269_v34  ;;  %v1526_v41 = vsel %vm1398_vm3, %v1265_v27, %v1462_v33 }
 0x2bd   : > { %v1527_v38 = vsel %vm1399_vm4, %v1267_v30, %v1463_v35 }
 0x2be   : > { %v1613_v39 = vpack.c.bf16 %v1527_v38, %v1525_v37  ;;  %v1272_v40 = vpop.f32.mrb[20].mxu1  ;;  %v1528_v42 = vsel %vm1400_vm5, %v1269_v34, %v1464_v36  ;;  %v1015_v34 = vpop.permute.xlu0 %1014 }
 0x2bf   : > { %v1273_v43 = vadd.f32 %v1272_v40, %v985_v32  ;;  %v1274_v44 = vpop.f32.mrb[21].mxu1  ;;  %v1614_v45 = vpack.c.bf16 %v1528_v42, %v1526_v41  ;;  %v1020_v42 = vpop.permute.xlu1 %1019 }
 0x2c0   : > { %v1275_v47 = vadd.f32 %v1274_v44, %v985_v32  ;;  %v1276_v48 = vpop.f32.mrb[22].mxu1 }
 0x2c1   : > { %v1465_v49 = vmul.f32 0.01, %v1273_v43  ;;  %v1277_v50 = vadd.f32 %v1276_v48, %v990_v46  ;;  %v1278_v51 = vpop.f32.mrb[23].mxu1  ;;  %1997 = vmatprep.subr.bf16.mxu0 %v1614_v45  ;;  %vm1401_vm6 = vcmp.ge.f32.partialorder %v1273_v43, 0.0 }
 0x2c2   : > { %v1466_v52 = vmul.f32 0.01, %v1275_v47  ;;  %v1279_v53 = vadd.f32 %v1278_v51, %v990_v46  ;;  %1998 = vmatpush1.bf16.msra.mxu0 %v1613_v39  ;;  %vm1402_vm7 = vcmp.ge.f32.partialorder %v1275_v47, 0.0 }
 0x2c3   : > { %vm1403_vm8 = vcmp.ge.f32.partialorder %v1277_v50, 0.0  ;;  %v1467_v54 = vmul.f32 0.01, %v1277_v50  ;;  %v1529_v56 = vsel %vm1401_vm6, %v1273_v43, %v1465_v49 }
 0x2c4   : > { %vm1404_vm9 = vcmp.ge.f32.partialorder %v1279_v53, 0.0  ;;  %v1468_v55 = vmul.f32 0.01, %v1279_v53  ;;  %v1530_v61 = vsel %vm1402_vm7, %v1275_v47, %v1466_v52 }
 0x2c5   : > { %v1531_v57 = vsel %vm1403_vm8, %v1277_v50, %v1467_v54  ;;  %v1025_v54 = vpop.permute.xlu0 %1024 }
 0x2c6   : > { %v1615_v59 = vpack.c.bf16 %v1531_v57, %v1529_v56  ;;  %v1282_v60 = vpop.f32.mrb[24].mxu1  ;;  %v1532_v62 = vsel %vm1404_vm9, %v1279_v53, %v1468_v55 }
 0x2c7   : > { %v1283_v63 = vadd.f32 %v1282_v60, %v995_v58  ;;  %v1284_v1 = vpop.f32.mrb[25].mxu1  ;;  %v1616_v3 = vpack.c.bf16 %v1532_v62, %v1530_v61  ;;  %v1030_v62 = vpop.permute.xlu1 %1029 }
 0x2c8   : > { %v1285_v0 = vadd.f32 %v1284_v1, %v995_v58  ;;  %v1286_v5 = vpop.f32.mrb[26].mxu1 }
 0x2c9   : > { %v1469_v6 = vmul.f32 0.01, %v1283_v63  ;;  %v1287_v7 = vadd.f32 %v1286_v5, %v1000_v4  ;;  %v1288_v8 = vpop.f32.mrb[27].mxu1  ;;  %1999 = vmatprep.subr.bf16.mxu0 %v1616_v3  ;;  %vm1405_vm10 = vcmp.ge.f32.partialorder %v1283_v63, 0.0 }
 0x2ca   : > { %v1470_v9 = vmul.f32 0.01, %v1285_v0  ;;  %v1289_v10 = vadd.f32 %v1288_v8, %v1000_v4  ;;  %2000 = vmatpush1.bf16.msra.mxu0 %v1615_v59  ;;  %vm1406_vm11 = vcmp.ge.f32.partialorder %v1285_v0, 0.0 }
 0x2cb   : > { %vm1407_vm12 = vcmp.ge.f32.partialorder %v1287_v7, 0.0  ;;  %v1471_v11 = vmul.f32 0.01, %v1287_v7  ;;  %v1533_v14 = vsel %vm1405_vm10, %v1283_v63, %v1469_v6 }
 0x2cc   : > { %vm1408_vm13 = vcmp.ge.f32.partialorder %v1289_v10, 0.0  ;;  %v1472_v13 = vmul.f32 0.01, %v1289_v10  ;;  %v1534_v19 = vsel %vm1406_vm11, %v1285_v0, %v1470_v9 }
 0x2cd   : > { %v1535_v15 = vsel %vm1407_vm12, %v1287_v7, %v1471_v11  ;;  %v1035_v11 = vpop.permute.xlu0 %1034 }
 0x2ce   : > { %v1617_v17 = vpack.c.bf16 %v1535_v15, %v1533_v14  ;;  %v1292_v18 = vpop.f32.mrb[28].mxu1  ;;  %v1536_v2 = vsel %vm1408_vm13, %v1289_v10, %v1472_v13 }
 0x2cf   : > { %v1293_v12 = vadd.f32 %v1292_v18, %v1005_v16  ;;  %v1294_v20 = vpop.f32.mrb[29].mxu1  ;;  %v1618_v21 = vpack.c.bf16 %v1536_v2, %v1534_v19  ;;  %v1040_v2 = vpop.permute.xlu1 %1039 }
 0x2d0   : > { %v1295_v23 = vadd.f32 %v1294_v20, %v1005_v16  ;;  %v1296_v24 = vpop.f32.mrb[30].mxu1 }
 0x2d1   : > { %v1473_v25 = vmul.f32 0.01, %v1293_v12  ;;  %v1297_v26 = vadd.f32 %v1296_v24, %v1010_v22  ;;  %v1298_v27 = vpop.f32.mrb[31].mxu1  ;;  %2001 = vmatprep.subr.bf16.mxu0 %v1618_v21  ;;  %vm1409_vm14 = vcmp.ge.f32.partialorder %v1293_v12, 0.0 }
 0x2d2   : > { %v1474_v28 = vmul.f32 0.01, %v1295_v23  ;;  %v1299_v29 = vadd.f32 %v1298_v27, %v1010_v22  ;;  %2002 = vmatpush1.bf16.msra.mxu0 %v1617_v17  ;;  %vm1410_vm15 = vcmp.ge.f32.partialorder %v1295_v23, 0.0 }
 0x2d3   : > { %vm1411_vm0 = vcmp.ge.f32.partialorder %v1297_v26, 0.0  ;;  %v1475_v30 = vmul.f32 0.01, %v1297_v26  ;;  %v1537_v32 = vsel %vm1409_vm14, %v1293_v12, %v1473_v25 }
 0x2d4   : > { %vm1412_vm1 = vcmp.ge.f32.partialorder %v1299_v29, 0.0  ;;  %v1476_v31 = vmul.f32 0.01, %v1299_v29  ;;  %v1538_v37 = vsel %vm1410_vm15, %v1295_v23, %v1474_v28 }
 0x2d5   : > { %v1539_v33 = vsel %vm1411_vm0, %v1297_v26, %v1475_v30  ;;  %v1045_v30 = vpop.permute.xlu0 %1044 }
 0x2d6   : > { %v1619_v35 = vpack.c.bf16 %v1539_v33, %v1537_v32  ;;  %v1302_v36 = vpop.f32.mrb[32].mxu1  ;;  %v1540_v38 = vsel %vm1412_vm1, %v1299_v29, %v1476_v31 }
 0x2d7   : > { %v1303_v39 = vadd.f32 %v1302_v36, %v1015_v34  ;;  %v1304_v40 = vpop.f32.mrb[33].mxu1  ;;  %v1620_v41 = vpack.c.bf16 %v1540_v38, %v1538_v37  ;;  %v1050_v38 = vpop.permute.xlu1 %1049 }
 0x2d8   : > { %v1305_v43 = vadd.f32 %v1304_v40, %v1015_v34  ;;  %v1306_v44 = vpop.f32.mrb[34].mxu1 }
 0x2d9   : > { %v1477_v45 = vmul.f32 0.01, %v1303_v39  ;;  %v1307_v46 = vadd.f32 %v1306_v44, %v1020_v42  ;;  %v1308_v47 = vpop.f32.mrb[35].mxu1  ;;  %2003 = vmatprep.subr.bf16.mxu0 %v1620_v41  ;;  %vm1413_vm2 = vcmp.ge.f32.partialorder %v1303_v39, 0.0 }
 0x2da   : > { %v1478_v48 = vmul.f32 0.01, %v1305_v43  ;;  %v1309_v49 = vadd.f32 %v1308_v47, %v1020_v42  ;;  %2004 = vmatpush1.bf16.msra.mxu0 %v1619_v35  ;;  %vm1414_vm3 = vcmp.ge.f32.partialorder %v1305_v43, 0.0 }
 0x2db   : > { %vm1415_vm4 = vcmp.ge.f32.partialorder %v1307_v46, 0.0  ;;  %v1479_v50 = vmul.f32 0.01, %v1307_v46  ;;  %v1541_v52 = vsel %vm1413_vm2, %v1303_v39, %v1477_v45 }
 0x2dc   : > { %vm1416_vm5 = vcmp.ge.f32.partialorder %v1309_v49, 0.0  ;;  %v1480_v51 = vmul.f32 0.01, %v1309_v49  ;;  %v1542_v57 = vsel %vm1414_vm3, %v1305_v43, %v1478_v48 }
 0x2dd   : > { %v1543_v53 = vsel %vm1415_vm4, %v1307_v46, %v1479_v50  ;;  %v1055_v50 = vpop.permute.xlu0 %1054 }
 0x2de   : > { %v1621_v55 = vpack.c.bf16 %v1543_v53, %v1541_v52  ;;  %v1312_v56 = vpop.f32.mrb[36].mxu1  ;;  %v1544_v58 = vsel %vm1416_vm5, %v1309_v49, %v1480_v51 }
 0x2df   : > { %v1313_v59 = vadd.f32 %v1312_v56, %v1025_v54  ;;  %v1314_v60 = vpop.f32.mrb[37].mxu1  ;;  %v1622_v61 = vpack.c.bf16 %v1544_v58, %v1542_v57  ;;  %v1060_v58 = vpop.permute.xlu1 %1059 }
 0x2e0   : > { %v1315_v63 = vadd.f32 %v1314_v60, %v1025_v54  ;;  %v1316_v1 = vpop.f32.mrb[38].mxu1 }
 0x2e1   : > { %v1481_v3 = vmul.f32 0.01, %v1313_v59  ;;  %v1317_v4 = vadd.f32 %v1316_v1, %v1030_v62  ;;  %v1318_v0 = vpop.f32.mrb[39].mxu1  ;;  %2005 = vmatprep.subr.bf16.mxu0 %v1622_v61  ;;  %vm1417_vm6 = vcmp.ge.f32.partialorder %v1313_v59, 0.0 }
 0x2e2   : > { %v1482_v5 = vmul.f32 0.01, %v1315_v63  ;;  %v1319_v6 = vadd.f32 %v1318_v0, %v1030_v62  ;;  %2006 = vmatpush1.bf16.msra.mxu0 %v1621_v55  ;;  %vm1418_vm7 = vcmp.ge.f32.partialorder %v1315_v63, 0.0 }
 0x2e3   : > { %vm1419_vm8 = vcmp.ge.f32.partialorder %v1317_v4, 0.0  ;;  %v1483_v7 = vmul.f32 0.01, %v1317_v4  ;;  %v1545_v9 = vsel %vm1417_vm6, %v1313_v59, %v1481_v3 }
 0x2e4   : > { %vm1420_vm9 = vcmp.ge.f32.partialorder %v1319_v6, 0.0  ;;  %v1484_v8 = vmul.f32 0.01, %v1319_v6  ;;  %v1546_v15 = vsel %vm1418_vm7, %v1315_v63, %v1482_v5 }
 0x2e5   : > { %v1547_v10 = vsel %vm1419_vm8, %v1317_v4, %v1483_v7  ;;  %v1065_v7 = vpop.permute.xlu0 %1064 }
 0x2e6   : > { %v1623_v13 = vpack.c.bf16 %v1547_v10, %v1545_v9  ;;  %v1322_v14 = vpop.f32.mrb[40].mxu1  ;;  %v1548_v16 = vsel %vm1420_vm9, %v1319_v6, %v1484_v8 }
 0x2e7   : > { %v1323_v17 = vadd.f32 %v1322_v14, %v1035_v11  ;;  %v1324_v18 = vpop.f32.mrb[41].mxu1  ;;  %v1624_v19 = vpack.c.bf16 %v1548_v16, %v1546_v15  ;;  %v1070_v16 = vpop.permute.xlu1 %1069 }
 0x2e8   : > { %v1325_v12 = vadd.f32 %v1324_v18, %v1035_v11  ;;  %v1326_v20 = vpop.f32.mrb[42].mxu1 }
 0x2e9   : > { %v1485_v21 = vmul.f32 0.01, %v1323_v17  ;;  %v1327_v22 = vadd.f32 %v1326_v20, %v1040_v2  ;;  %v1328_v23 = vpop.f32.mrb[43].mxu1  ;;  %2007 = vmatprep.subr.bf16.mxu0 %v1624_v19  ;;  %vm1421_vm10 = vcmp.ge.f32.partialorder %v1323_v17, 0.0 }
 0x2ea   : > { %v1486_v24 = vmul.f32 0.01, %v1325_v12  ;;  %v1329_v25 = vadd.f32 %v1328_v23, %v1040_v2  ;;  %2008 = vmatpush1.bf16.msra.mxu0 %v1623_v13  ;;  %vm1422_vm11 = vcmp.ge.f32.partialorder %v1325_v12, 0.0 }
 0x2eb   : > { %vm1423_vm12 = vcmp.ge.f32.partialorder %v1327_v22, 0.0  ;;  %v1487_v26 = vmul.f32 0.01, %v1327_v22  ;;  %v1549_v28 = vsel %vm1421_vm10, %v1323_v17, %v1485_v21 }
 0x2ec   : > { %vm1424_vm13 = vcmp.ge.f32.partialorder %v1329_v25, 0.0  ;;  %v1488_v27 = vmul.f32 0.01, %v1329_v25  ;;  %v1550_v33 = vsel %vm1422_vm11, %v1325_v12, %v1486_v24 }
 0x2ed   : > { %v1551_v29 = vsel %vm1423_vm12, %v1327_v22, %v1487_v26  ;;  %v1075_v26 = vpop.permute.xlu0 %1074 }
 0x2ee   : > { %v1625_v31 = vpack.c.bf16 %v1551_v29, %v1549_v28  ;;  %v1332_v32 = vpop.f32.mrb[44].mxu1  ;;  %v1552_v34 = vsel %vm1424_vm13, %v1329_v25, %v1488_v27 }
 0x2ef   : > { %v1333_v35 = vadd.f32 %v1332_v32, %v1045_v30  ;;  %v1334_v36 = vpop.f32.mrb[45].mxu1  ;;  %v1626_v37 = vpack.c.bf16 %v1552_v34, %v1550_v33  ;;  %v1080_v34 = vpop.permute.xlu1 %1079 }
 0x2f0   : > { %v1335_v39 = vadd.f32 %v1334_v36, %v1045_v30  ;;  %v1336_v40 = vpop.f32.mrb[46].mxu1 }
 0x2f1   : > { %v1489_v41 = vmul.f32 0.01, %v1333_v35  ;;  %v1337_v42 = vadd.f32 %v1336_v40, %v1050_v38  ;;  %v1338_v43 = vpop.f32.mrb[47].mxu1  ;;  %2009 = vmatprep.subr.bf16.mxu0 %v1626_v37  ;;  %vm1425_vm14 = vcmp.ge.f32.partialorder %v1333_v35, 0.0 }
 0x2f2   : > { %v1490_v44 = vmul.f32 0.01, %v1335_v39  ;;  %v1339_v45 = vadd.f32 %v1338_v43, %v1050_v38  ;;  %2010 = vmatpush1.bf16.msra.mxu0 %v1625_v31  ;;  %vm1426_vm15 = vcmp.ge.f32.partialorder %v1335_v39, 0.0 }
 0x2f3   : > { %vm1427_vm0 = vcmp.ge.f32.partialorder %v1337_v42, 0.0  ;;  %v1491_v46 = vmul.f32 0.01, %v1337_v42  ;;  %v1553_v48 = vsel %vm1425_vm14, %v1333_v35, %v1489_v41 }
 0x2f4   : > { %vm1428_vm1 = vcmp.ge.f32.partialorder %v1339_v45, 0.0  ;;  %v1492_v47 = vmul.f32 0.01, %v1339_v45  ;;  %v1554_v53 = vsel %vm1426_vm15, %v1335_v39, %v1490_v44 }
 0x2f5   : > { %v1555_v49 = vsel %vm1427_vm0, %v1337_v42, %v1491_v46  ;;  %v1085_v46 = vpop.permute.xlu0 %1084 }
 0x2f6   : > { %v1627_v51 = vpack.c.bf16 %v1555_v49, %v1553_v48  ;;  %v1342_v52 = vpop.f32.mrb[48].mxu1  ;;  %v1556_v54 = vsel %vm1428_vm1, %v1339_v45, %v1492_v47 }
 0x2f7   : > { %v1343_v55 = vadd.f32 %v1342_v52, %v1055_v50  ;;  %v1344_v56 = vpop.f32.mrb[49].mxu1  ;;  %v1628_v57 = vpack.c.bf16 %v1556_v54, %v1554_v53  ;;  %v1090_v54 = vpop.permute.xlu1 %1089 }
 0x2f8   : > { %v1345_v59 = vadd.f32 %v1344_v56, %v1055_v50  ;;  %v1346_v60 = vpop.f32.mrb[50].mxu1 }
 0x2f9   : > { %v1493_v61 = vmul.f32 0.01, %v1343_v55  ;;  %v1347_v62 = vadd.f32 %v1346_v60, %v1060_v58  ;;  %v1348_v63 = vpop.f32.mrb[51].mxu1  ;;  %2011 = vmatprep.subr.bf16.mxu0 %v1628_v57  ;;  %vm1429_vm2 = vcmp.ge.f32.partialorder %v1343_v55, 0.0 }
 0x2fa   : > { %v1494_v1 = vmul.f32 0.01, %v1345_v59  ;;  %v1349_v3 = vadd.f32 %v1348_v63, %v1060_v58  ;;  %2012 = vmatpush1.bf16.msra.mxu0 %v1627_v51  ;;  %vm1430_vm3 = vcmp.ge.f32.partialorder %v1345_v59, 0.0 }
 0x2fb   : > { %vm1431_vm4 = vcmp.ge.f32.partialorder %v1347_v62, 0.0  ;;  %v1495_v4 = vmul.f32 0.01, %v1347_v62  ;;  %v1557_v5 = vsel %vm1429_vm2, %v1343_v55, %v1493_v61 }
 0x2fc   : > { %vm1432_vm5 = vcmp.ge.f32.partialorder %v1349_v3, 0.0  ;;  %v1496_v0 = vmul.f32 0.01, %v1349_v3  ;;  %v1558_v10 = vsel %vm1430_vm3, %v1345_v59, %v1494_v1 }
 0x2fd   : > { %v1559_v6 = vsel %vm1431_vm4, %v1347_v62, %v1495_v4 }
 0x2fe   : > { %v1629_v8 = vpack.c.bf16 %v1559_v6, %v1557_v5  ;;  %v1352_v9 = vpop.f32.mrb[52].mxu1  ;;  %v1560_v11 = vsel %vm1432_vm5, %v1349_v3, %v1496_v0 }
 0x2ff   : > { %v1353_v13 = vadd.f32 %v1352_v9, %v1065_v7  ;;  %v1354_v14 = vpop.f32.mrb[53].mxu1  ;;  %v1630_v15 = vpack.c.bf16 %v1560_v11, %v1558_v10  ;;  %v2774_v9 = vld [vmem:[%s3569_s5 + $0x10] ss:$8 sps:$4 sm:$0xff]   ;;  %v2775_v10 = vld [vmem:[%s3569_s5 + $0x24] ss:$8 sps:$4 sm:$0xff]  }
 0x300   : > { %v1355_v17 = vadd.f32 %v1354_v14, %v1065_v7  ;;  %v1356_v18 = vpop.f32.mrb[54].mxu1  ;;  %v2769_v7 = vld [vmem:[%s3569_s5] ss:$8 sps:$4 sm:$0xff]   ;;  %v2780_v14 = vld [vmem:[%s3569_s5 + $0x30] ss:$8 sps:$4 sm:$0xff]  }
 0x301   : > { %v1497_v19 = vmul.f32 0.01, %v1353_v13  ;;  %v1357_v2 = vadd.f32 %v1356_v18, %v1070_v16  ;;  %v1358_v12 = vpop.f32.mrb[55].mxu1  ;;  %2013 = vmatprep.subr.bf16.mxu0 %v1630_v15  ;;  %vm1433_vm6 = vcmp.ge.f32.partialorder %v1353_v13, 0.0  ;;  %v2777_v11 = vld [vmem:[%s3569_s5 + $0x20] ss:$8 sps:$4 sm:$0xff]  }
 0x302   : > { %v1498_v20 = vmul.f32 0.01, %v1355_v17  ;;  %v1359_v21 = vadd.f32 %v1358_v12, %v1070_v16  ;;  %2014 = vmatpush1.bf16.msra.mxu0 %v1629_v8  ;;  %vm1434_vm7 = vcmp.ge.f32.partialorder %v1355_v17, 0.0  ;;  %v2772_v8 = vld [vmem:[%s3569_s5 + $0x14] ss:$8 sps:$4 sm:$0xff]  }
 0x303   : > { %vm1435_vm8 = vcmp.ge.f32.partialorder %v1357_v2, 0.0  ;;  %v1499_v22 = vmul.f32 0.01, %v1357_v2  ;;  %v1561_v24 = vsel %vm1433_vm6, %v1353_v13, %v1497_v19  ;;  %v2778_v13 = vld [vmem:[%s3569_s5 + $0x34] ss:$8 sps:$4 sm:$0xff]  }
 0x304   : > { %vm1436_vm9 = vcmp.ge.f32.partialorder %v1359_v21, 0.0  ;;  %v1500_v23 = vmul.f32 0.01, %v1359_v21  ;;  %v1562_v29 = vsel %vm1434_vm7, %v1355_v17, %v1498_v20  ;;  %v2781_v15 = vld [vmem:[%s3569_s5 + $0x44] ss:$8 sps:$4 sm:$0xff]  }
 0x305   : > { %v1563_v25 = vsel %vm1435_vm8, %v1357_v2, %v1499_v22  ;;  %v2783_v16 = vld [vmem:[%s3569_s5 + $0x40] ss:$8 sps:$4 sm:$0xff]   ;;  %v2784_v17 = vld [vmem:[%s3569_s5 + $0x54] ss:$8 sps:$4 sm:$0xff]   ;;  %v2786_v18 = vld [vmem:[%s3569_s5 + $0x50] ss:$8 sps:$4 sm:$0xff]  }
 0x306   : > { %v1631_v27 = vpack.c.bf16 %v1563_v25, %v1561_v24  ;;  %v1362_v28 = vpop.f32.mrb[56].mxu1  ;;  %v1564_v30 = vsel %vm1436_vm9, %v1359_v21, %v1500_v23  ;;  %v2787_v19 = vld [vmem:[%s3569_s5 + $0x64] ss:$8 sps:$4 sm:$0xff]   ;;  %v2789_v2 = vld [vmem:[%s3569_s5 + $0x60] ss:$8 sps:$4 sm:$0xff]  }
 0x307   : > { %v1363_v31 = vadd.f32 %v1362_v28, %v1075_v26  ;;  %v1364_v32 = vpop.f32.mrb[57].mxu1  ;;  %v1632_v33 = vpack.c.bf16 %v1564_v30, %v1562_v29  ;;  %v2790_v12 = vld [vmem:[%s3569_s5 + $0x74] ss:$8 sps:$4 sm:$0xff]   ;;  %v2792_v20 = vld [vmem:[%s3569_s5 + $0x70] ss:$8 sps:$4 sm:$0xff]  }
 0x308   : > { %v1365_v35 = vadd.f32 %v1364_v32, %v1075_v26  ;;  %v1366_v36 = vpop.f32.mrb[58].mxu1  ;;  %v2793_v21 = vld [vmem:[%s3569_s5 + $0x84] ss:$8 sps:$4 sm:$0xff]   ;;  %v2795_v22 = vld [vmem:[%s3569_s5 + $0x80] ss:$8 sps:$4 sm:$0xff]  }
 0x309   : > { %v1501_v37 = vmul.f32 0.01, %v1363_v31  ;;  %v1367_v38 = vadd.f32 %v1366_v36, %v1080_v34  ;;  %v1368_v39 = vpop.f32.mrb[59].mxu1  ;;  %2015 = vmatprep.subr.bf16.mxu0 %v1632_v33  ;;  %vm1437_vm10 = vcmp.ge.f32.partialorder %v1363_v31, 0.0  ;;  %v2796_v23 = vld [vmem:[%s3569_s5 + $0x94] ss:$8 sps:$4 sm:$0xff]  }
 0x30a   : > { %v1502_v40 = vmul.f32 0.01, %v1365_v35  ;;  %v1369_v41 = vadd.f32 %v1368_v39, %v1080_v34  ;;  %2016 = vmatpush1.bf16.msra.mxu0 %v1631_v27  ;;  %vm1438_vm11 = vcmp.ge.f32.partialorder %v1365_v35, 0.0  ;;  %v2798_v24 = vld [vmem:[%s3569_s5 + $0x90] ss:$8 sps:$4 sm:$0xff]   ;;  %v2413_v39 = vlaneseq }
 0x30b   : > { %vm1439_vm12 = vcmp.ge.f32.partialorder %v1367_v38, 0.0  ;;  %v1503_v42 = vmul.f32 0.01, %v1367_v38  ;;  %v1565_v44 = vsel %vm1437_vm10, %v1363_v31, %v1501_v37  ;;  %v2799_v25 = vld [vmem:[%s3569_s5 + $0xa4] ss:$8 sps:$4 sm:$0xff]  }
 0x30c   : > { %vm1440_vm13 = vcmp.ge.f32.partialorder %v1369_v41, 0.0  ;;  %v1504_v43 = vmul.f32 0.01, %v1369_v41  ;;  %v1566_v49 = vsel %vm1438_vm11, %v1365_v35, %v1502_v40  ;;  %v2801_v26 = vld [vmem:[%s3569_s5 + $0xa0] ss:$8 sps:$4 sm:$0xff]  }
 0x30d   : > { %v1567_v45 = vsel %vm1439_vm12, %v1367_v38, %v1503_v42  ;;  %v2802_v27 = vld [vmem:[%s3569_s5 + $0xb4] ss:$8 sps:$4 sm:$0xff]   ;;  %v2804_v28 = vld [vmem:[%s3569_s5 + $0xb0] ss:$8 sps:$4 sm:$0xff]   ;;  %v2805_v29 = vld [vmem:[%s3569_s5 + $0xc4] ss:$8 sps:$4 sm:$0xff]   ;;  %v1672_v42 = vpop.permute.xlu0 %1671 }
 0x30e   : > { %v1633_v47 = vpack.c.bf16 %v1567_v45, %v1565_v44  ;;  %v1372_v48 = vpop.f32.mrb[60].mxu1  ;;  %v1568_v50 = vsel %vm1440_vm13, %v1369_v41, %v1504_v43  ;;  %v2807_v30 = vld [vmem:[%s3569_s5 + $0xc0] ss:$8 sps:$4 sm:$0xff]   ;;  %v2808_v31 = vld [vmem:[%s3569_s5 + $0xd4] ss:$8 sps:$4 sm:$0xff]   ;;  %v3490_v41 = vshrl.u32 %v2413_v39, 7 }
 0x30f   : > { %v1373_v51 = vadd.f32 %v1372_v48, %v1085_v46  ;;  %v1374_v52 = vpop.f32.mrb[61].mxu1  ;;  %v1634_v53 = vpack.c.bf16 %v1568_v50, %v1566_v49  ;;  %v2810_v32 = vld [vmem:[%s3569_s5 + $0xd0] ss:$8 sps:$4 sm:$0xff]   ;;  %v2811_v33 = vld [vmem:[%s3569_s5 + $0xe4] ss:$8 sps:$4 sm:$0xff]   ;;  %v1677_v48 = vpop.permute.xlu1 %1676 }
 0x310   : > { %v1375_v55 = vadd.f32 %v1374_v52, %v1085_v46  ;;  %v1376_v56 = vpop.f32.mrb[62].mxu1  ;;  %v2813_v34 = vld [vmem:[%s3569_s5 + $0xe0] ss:$8 sps:$4 sm:$0xff]   ;;  %v2814_v35 = vld [vmem:[%s3569_s5 + $0xf4] ss:$8 sps:$4 sm:$0xff]  }
 0x311   : > { %v1505_v57 = vmul.f32 0.01, %v1373_v51  ;;  %v1377_v58 = vadd.f32 %v1376_v56, %v1090_v54  ;;  %v1378_v59 = vpop.f32.mrb[63].mxu1  ;;  %2017 = vmatprep.subr.bf16.mxu0 %v1634_v53  ;;  %vm1441_vm14 = vcmp.ge.f32.partialorder %v1373_v51, 0.0  ;;  %v2816_v36 = vld [vmem:[%s3569_s5 + $0xf0] ss:$8 sps:$4 sm:$0xff]  }
 0x312   : > { %v1506_v60 = vmul.f32 0.01, %v1375_v55  ;;  %v1379_v61 = vadd.f32 %v1378_v59, %v1090_v54  ;;  %2018 = vmatpush1.bf16.msra.mxu0 %v1633_v47  ;;  %vm1442_vm15 = vcmp.ge.f32.partialorder %v1375_v55, 0.0  ;;  %v2882_v37 = vmov 1966171168  }
 0x313   : > { %vm1443_vm0 = vcmp.ge.f32.partialorder %v1377_v58, 0.0  ;;  %v1507_v62 = vmul.f32 0.01, %v1377_v58  ;;  %v1569_v1 = vsel %vm1441_vm14, %v1373_v51, %v1505_v57  ;;  %v2427_v38 = vunpack.c.l.s4 %v2882_v37 }
 0x314   : > { %vm1444_vm1 = vcmp.ge.f32.partialorder %v1379_v61, 0.0  ;;  %v1508_v63 = vmul.f32 0.01, %v1379_v61  ;;  %v1570_v0 = vsel %vm1442_vm15, %v1375_v55, %v1506_v60 }
 0x315   : > { %v1571_v3 = vsel %vm1443_vm0, %v1377_v58, %v1507_v62  ;;  %v2428_v40 = vunpack.c.0.s8 %v2427_v38  ;;  %v3498_v47 = vld.sshfl [vmem:[%s3571_s7] sm:$0x11 pattern:$0x75316420]  ;;  %v1682_v62 = vpop.permute.xlu0 %1681 }
 0x316   : > { %v1635_v4 = vpack.c.bf16 %v1571_v3, %v1569_v1  ;;  %v1572_v5 = vsel %vm1444_vm1, %v1379_v61, %v1508_v63  ;;  %v2425_v51 = vcombine.high %v3498_v47, %v3498_v47 }
 0x317   : > { %v1636_v6 = vpack.c.bf16 %v1572_v5, %v1570_v0  ;;  %v3493_v44 = vsub.s32 %v2428_v40, %v3490_v41 }
 0x319   : > { %2019 = vmatprep.subr.bf16.mxu0 %v1636_v6  ;;  %v2439_v58 = vrot.slane %v2425_v51, %v3493_v44 }
 0x31a   : > { %2020 = vmatpush1.bf16.msra.mxu0 %v1635_v4 }
 0x31b   : > { %2474 = vmatprep.mubr.bf16.mxu1 %v2439_v58 }
 0x31d   : > { %2022 = vmatmul.mubr.bf16.vlgmr.msra.gmra.mrb[32].mxu0 %v2769_v7  ;;  %v1687_v7 = vpop.permute.xlu1 %1686 }
 0x31e   : > { %2031 = vmatprep.mubr.bf16.mxu0 %v2772_v8 }
 0x325   : > { %2032 = vmatmul.mubr.bf16.gmra.mrb[36].mxu0 %v2774_v9 }
 0x326   : > { %2041 = vmatprep.mubr.bf16.mxu0 %v2775_v10 }
 0x32d   : > { %2042 = vmatmul.mubr.bf16.gmra.mrb[40].mxu0 %v2777_v11 }
 0x32e   : > { %2051 = vmatprep.mubr.bf16.mxu0 %v2778_v13 }
 0x335   : > { %2052 = vmatmul.mubr.bf16.gmra.mrb[44].mxu0 %v2780_v14 }
 0x336   : > { %2061 = vmatprep.mubr.bf16.mxu0 %v2781_v15 }
 0x33d   : > { %2062 = vmatmul.mubr.bf16.gmra.mrb[48].mxu0 %v2783_v16 }
 0x33e   : > { %2071 = vmatprep.mubr.bf16.mxu0 %v2784_v17 }
 0x345   : > { %2072 = vmatmul.mubr.bf16.gmra.mrb[52].mxu0 %v2786_v18 }
 0x346   : > { %2081 = vmatprep.mubr.bf16.mxu0 %v2787_v19 }
 0x34d   : > { %2082 = vmatmul.mubr.bf16.gmra.mrb[56].mxu0 %v2789_v2  ;;  %v1692_v2 = vpop.permute.xlu0 %1691 }
 0x34e   : > { %2091 = vmatprep.mubr.bf16.mxu0 %v2790_v12 }
 0x351   : > { %v1702_v38 = vpop.permute.xlu0 %1701 }
 0x355   : > { %2092 = vmatmul.mubr.bf16.gmra.mrb[60].mxu0 %v2792_v20 }
 0x356   : > { %2101 = vmatprep.mubr.bf16.mxu0 %v2793_v21 }
 0x35d   : > { %2102 = vmatmul.mubr.bf16.gmra.mrb[64].mxu0 %v2795_v22 }
 0x35e   : > { %2111 = vmatprep.mubr.bf16.mxu0 %v2796_v23 }
 0x365   : > { %2112 = vmatmul.mubr.bf16.gmra.mrb[68].mxu0 %v2798_v24 }
 0x366   : > { %2121 = vmatprep.mubr.bf16.mxu0 %v2799_v25 }
 0x36d   : > { %2122 = vmatmul.mubr.bf16.gmra.mrb[72].mxu0 %v2801_v26  ;;  %v1697_v26 = vpop.permute.xlu1 %1696 }
 0x36e   : > { %2131 = vmatprep.mubr.bf16.mxu0 %v2802_v27 }
 0x375   : > { %2132 = vmatmul.mubr.bf16.gmra.mrb[76].mxu0 %v2804_v28 }
 0x376   : > { %2141 = vmatprep.mubr.bf16.mxu0 %v2805_v29 }
 0x37d   : > { %2142 = vmatmul.mubr.bf16.gmra.mrb[80].mxu0 %v2807_v30 }
 0x37e   : > { %2151 = vmatprep.mubr.bf16.mxu0 %v2808_v31 }
 0x385   : > { %2152 = vmatmul.mubr.bf16.gmra.mrb[84].mxu0 %v2810_v32 }
 0x386   : > { %2161 = vmatprep.mubr.bf16.mxu0 %v2811_v33 }
 0x38d   : > { %2162 = vmatmul.mubr.bf16.gmra.mrb[88].mxu0 %v2813_v34 }
 0x38e   : > { %2171 = vmatprep.mubr.bf16.mxu0 %v2814_v35 }
 0x395   : > { %2172 = vmatmul.mubr.bf16.gmra.mrb[92].mxu0 %v2816_v36 }
 0x3f0   : > { %v2023_v43 = vpop.f32.mrb[32].mxu0 }
 0x3f1   : > { %v2024_v45 = vadd.f32 %v2023_v43, %v1672_v42  ;;  %v2025_v46 = vpop.f32.mrb[33].mxu0 }
 0x3f2   : > { %v2026_v49 = vadd.f32 %v2025_v46, %v1672_v42  ;;  %v2027_v50 = vpop.f32.mrb[34].mxu0 }
 0x3f3   : > { %v2246_v52 = vmul.f32 0.01, %v2024_v45  ;;  %v2028_v53 = vadd.f32 %v2027_v50, %v1677_v48  ;;  %v2029_v54 = vpop.f32.mrb[35].mxu0  ;;  %vm2182_vm2 = vcmp.ge.f32.partialorder %v2024_v45, 0.0  ;;  %v1707_v50 = vpop.permute.xlu1 %1706 }
 0x3f4   : > { %v2247_v55 = vmul.f32 0.01, %v2026_v49  ;;  %v2030_v56 = vadd.f32 %v2029_v54, %v1677_v48  ;;  %vm2183_vm3 = vcmp.ge.f32.partialorder %v2026_v49, 0.0 }
 0x3f5   : > { %vm2184_vm4 = vcmp.ge.f32.partialorder %v2028_v53, 0.0  ;;  %v2248_v57 = vmul.f32 0.01, %v2028_v53  ;;  %v2310_v60 = vsel %vm2182_vm2, %v2024_v45, %v2246_v52 }
 0x3f6   : > { %vm2185_vm5 = vcmp.ge.f32.partialorder %v2030_v56, 0.0  ;;  %v2249_v59 = vmul.f32 0.01, %v2030_v56  ;;  %v2311_v3 = vsel %vm2183_vm3, %v2026_v49, %v2247_v55 }
 0x3f7   : > { %v2312_v61 = vsel %vm2184_vm4, %v2028_v53, %v2248_v57 }
 0x3f8   : > { %v2375_v63 = vpack.c.bf16 %v2312_v61, %v2310_v60  ;;  %v2033_v1 = vpop.f32.mrb[36].mxu0  ;;  %v2313_v4 = vsel %vm2185_vm5, %v2030_v56, %v2249_v59 }
 0x3f9   : > { %v2034_v0 = vadd.f32 %v2033_v1, %v1682_v62  ;;  %v2035_v5 = vpop.f32.mrb[37].mxu0  ;;  %v2376_v6 = vpack.c.bf16 %v2313_v4, %v2311_v3 }
 0x3fa   : > { %v2036_v8 = vadd.f32 %v2035_v5, %v1682_v62  ;;  %v2037_v9 = vpop.f32.mrb[38].mxu0  ;;  %v1712_v62 = vpop.permute.xlu0 %1711 }
 0x3fb   : > { %v2250_v10 = vmul.f32 0.01, %v2034_v0  ;;  %v2038_v11 = vadd.f32 %v2037_v9, %v1687_v7  ;;  %v2039_v13 = vpop.f32.mrb[39].mxu0  ;;  %2442 = vmatprep.subr.bf16.mxu1 %v2376_v6  ;;  %vm2186_vm6 = vcmp.ge.f32.partialorder %v2034_v0, 0.0 }
 0x3fc   : > { %v2251_v14 = vmul.f32 0.01, %v2036_v8  ;;  %v2040_v15 = vadd.f32 %v2039_v13, %v1687_v7  ;;  %2443 = vmatpush1.bf16.msra.mxu1 %v2375_v63  ;;  %vm2187_vm7 = vcmp.ge.f32.partialorder %v2036_v8, 0.0  ;;  %v1717_v7 = vpop.permute.xlu1 %1716 }
 0x3fd   : > { %vm2188_vm8 = vcmp.ge.f32.partialorder %v2038_v11, 0.0  ;;  %v2252_v16 = vmul.f32 0.01, %v2038_v11  ;;  %v2314_v18 = vsel %vm2186_vm6, %v2034_v0, %v2250_v10 }
 0x3fe   : > { %vm2189_vm9 = vcmp.ge.f32.partialorder %v2040_v15, 0.0  ;;  %v2253_v17 = vmul.f32 0.01, %v2040_v15  ;;  %v2315_v21 = vsel %vm2187_vm7, %v2036_v8, %v2251_v14 }
 0x3ff   : > { %v2316_v19 = vsel %vm2188_vm8, %v2038_v11, %v2252_v16 }
 0x400   : > { %v2377_v12 = vpack.c.bf16 %v2316_v19, %v2314_v18  ;;  %v2043_v20 = vpop.f32.mrb[40].mxu0  ;;  %v2317_v22 = vsel %vm2189_vm9, %v2040_v15, %v2253_v17 }
 0x401   : > { %v2044_v23 = vadd.f32 %v2043_v20, %v1692_v2  ;;  %v2045_v24 = vpop.f32.mrb[41].mxu0  ;;  %v2378_v25 = vpack.c.bf16 %v2317_v22, %v2315_v21 }
 0x402   : > { %v2046_v27 = vadd.f32 %v2045_v24, %v1692_v2  ;;  %v2047_v28 = vpop.f32.mrb[42].mxu0  ;;  %v1722_v2 = vpop.permute.xlu0 %1721 }
 0x403   : > { %v2254_v29 = vmul.f32 0.01, %v2044_v23  ;;  %v2048_v30 = vadd.f32 %v2047_v28, %v1697_v26  ;;  %v2049_v31 = vpop.f32.mrb[43].mxu0  ;;  %2444 = vmatprep.subr.bf16.mxu1 %v2378_v25  ;;  %vm2190_vm10 = vcmp.ge.f32.partialorder %v2044_v23, 0.0 }
 0x404   : > { %v2255_v32 = vmul.f32 0.01, %v2046_v27  ;;  %v2050_v33 = vadd.f32 %v2049_v31, %v1697_v26  ;;  %2445 = vmatpush1.bf16.msra.mxu1 %v2377_v12  ;;  %vm2191_vm11 = vcmp.ge.f32.partialorder %v2046_v27, 0.0  ;;  %v1727_v26 = vpop.permute.xlu1 %1726 }
 0x405   : > { %vm2192_vm12 = vcmp.ge.f32.partialorder %v2048_v30, 0.0  ;;  %v2256_v34 = vmul.f32 0.01, %v2048_v30  ;;  %v2318_v36 = vsel %vm2190_vm10, %v2044_v23, %v2254_v29 }
 0x406   : > { %vm2193_vm13 = vcmp.ge.f32.partialorder %v2050_v33, 0.0  ;;  %v2257_v35 = vmul.f32 0.01, %v2050_v33  ;;  %v2319_v43 = vsel %vm2191_vm11, %v2046_v27, %v2255_v32 }
 0x407   : > { %v2320_v37 = vsel %vm2192_vm12, %v2048_v30, %v2256_v34 }
 0x408   : > { %v2379_v40 = vpack.c.bf16 %v2320_v37, %v2318_v36  ;;  %v2053_v42 = vpop.f32.mrb[44].mxu0  ;;  %v2321_v45 = vsel %vm2193_vm13, %v2050_v33, %v2257_v35 }
 0x409   : > { %v2054_v46 = vadd.f32 %v2053_v42, %v1702_v38  ;;  %v2055_v48 = vpop.f32.mrb[45].mxu0  ;;  %v2380_v49 = vpack.c.bf16 %v2321_v45, %v2319_v43 }
 0x40a   : > { %v2056_v51 = vadd.f32 %v2055_v48, %v1702_v38  ;;  %v2057_v52 = vpop.f32.mrb[46].mxu0  ;;  %v1732_v38 = vpop.permute.xlu0 %1731 }
 0x40b   : > { %v2258_v53 = vmul.f32 0.01, %v2054_v46  ;;  %v2058_v54 = vadd.f32 %v2057_v52, %v1707_v50  ;;  %v2059_v55 = vpop.f32.mrb[47].mxu0  ;;  %2446 = vmatprep.subr.bf16.mxu1 %v2380_v49  ;;  %vm2194_vm14 = vcmp.ge.f32.partialorder %v2054_v46, 0.0 }
 0x40c   : > { %v2259_v56 = vmul.f32 0.01, %v2056_v51  ;;  %v2060_v57 = vadd.f32 %v2059_v55, %v1707_v50  ;;  %2447 = vmatpush1.bf16.msra.mxu1 %v2379_v40  ;;  %vm2195_vm15 = vcmp.ge.f32.partialorder %v2056_v51, 0.0  ;;  %v1737_v50 = vpop.permute.xlu1 %1736 }
 0x40d   : > { %vm2196_vm0 = vcmp.ge.f32.partialorder %v2058_v54, 0.0  ;;  %v2260_v58 = vmul.f32 0.01, %v2058_v54  ;;  %v2322_v60 = vsel %vm2194_vm14, %v2054_v46, %v2258_v53 }
 0x40e   : > { %vm2197_vm1 = vcmp.ge.f32.partialorder %v2060_v57, 0.0  ;;  %v2261_v59 = vmul.f32 0.01, %v2060_v57  ;;  %v2323_v3 = vsel %vm2195_vm15, %v2056_v51, %v2259_v56 }
 0x40f   : > { %v2324_v61 = vsel %vm2196_vm0, %v2058_v54, %v2260_v58 }
 0x410   : > { %v2381_v63 = vpack.c.bf16 %v2324_v61, %v2322_v60  ;;  %v2063_v1 = vpop.f32.mrb[48].mxu0  ;;  %v2325_v4 = vsel %vm2197_vm1, %v2060_v57, %v2261_v59 }
 0x411   : > { %v2064_v0 = vadd.f32 %v2063_v1, %v1712_v62  ;;  %v2065_v5 = vpop.f32.mrb[49].mxu0  ;;  %v2382_v6 = vpack.c.bf16 %v2325_v4, %v2323_v3 }
 0x412   : > { %v2066_v8 = vadd.f32 %v2065_v5, %v1712_v62  ;;  %v2067_v9 = vpop.f32.mrb[50].mxu0  ;;  %v1742_v62 = vpop.permute.xlu0 %1741 }
 0x413   : > { %v2262_v10 = vmul.f32 0.01, %v2064_v0  ;;  %v2068_v11 = vadd.f32 %v2067_v9, %v1717_v7  ;;  %v2069_v13 = vpop.f32.mrb[51].mxu0  ;;  %2448 = vmatprep.subr.bf16.mxu1 %v2382_v6  ;;  %vm2198_vm2 = vcmp.ge.f32.partialorder %v2064_v0, 0.0 }
 0x414   : > { %v2263_v14 = vmul.f32 0.01, %v2066_v8  ;;  %v2070_v15 = vadd.f32 %v2069_v13, %v1717_v7  ;;  %2449 = vmatpush1.bf16.msra.mxu1 %v2381_v63  ;;  %vm2199_vm3 = vcmp.ge.f32.partialorder %v2066_v8, 0.0  ;;  %v1747_v7 = vpop.permute.xlu1 %1746 }
 0x415   : > { %vm2200_vm4 = vcmp.ge.f32.partialorder %v2068_v11, 0.0  ;;  %v2264_v16 = vmul.f32 0.01, %v2068_v11  ;;  %v2326_v18 = vsel %vm2198_vm2, %v2064_v0, %v2262_v10 }
 0x416   : > { %vm2201_vm5 = vcmp.ge.f32.partialorder %v2070_v15, 0.0  ;;  %v2265_v17 = vmul.f32 0.01, %v2070_v15  ;;  %v2327_v21 = vsel %vm2199_vm3, %v2066_v8, %v2263_v14 }
 0x417   : > { %v2328_v19 = vsel %vm2200_vm4, %v2068_v11, %v2264_v16 }
 0x418   : > { %v2383_v12 = vpack.c.bf16 %v2328_v19, %v2326_v18  ;;  %v2073_v20 = vpop.f32.mrb[52].mxu0  ;;  %v2329_v22 = vsel %vm2201_vm5, %v2070_v15, %v2265_v17 }
 0x419   : > { %v2074_v23 = vadd.f32 %v2073_v20, %v1722_v2  ;;  %v2075_v24 = vpop.f32.mrb[53].mxu0  ;;  %v2384_v25 = vpack.c.bf16 %v2329_v22, %v2327_v21 }
 0x41a   : > { %v2076_v27 = vadd.f32 %v2075_v24, %v1722_v2  ;;  %v2077_v28 = vpop.f32.mrb[54].mxu0  ;;  %v1752_v2 = vpop.permute.xlu0 %1751 }
 0x41b   : > { %v2266_v29 = vmul.f32 0.01, %v2074_v23  ;;  %v2078_v30 = vadd.f32 %v2077_v28, %v1727_v26  ;;  %v2079_v31 = vpop.f32.mrb[55].mxu0  ;;  %2450 = vmatprep.subr.bf16.mxu1 %v2384_v25  ;;  %vm2202_vm6 = vcmp.ge.f32.partialorder %v2074_v23, 0.0 }
 0x41c   : > { %v2267_v32 = vmul.f32 0.01, %v2076_v27  ;;  %v2080_v33 = vadd.f32 %v2079_v31, %v1727_v26  ;;  %2451 = vmatpush1.bf16.msra.mxu1 %v2383_v12  ;;  %vm2203_vm7 = vcmp.ge.f32.partialorder %v2076_v27, 0.0  ;;  %v1757_v26 = vpop.permute.xlu1 %1756 }
 0x41d   : > { %vm2204_vm8 = vcmp.ge.f32.partialorder %v2078_v30, 0.0  ;;  %v2268_v34 = vmul.f32 0.01, %v2078_v30  ;;  %v2330_v36 = vsel %vm2202_vm6, %v2074_v23, %v2266_v29 }
 0x41e   : > { %vm2205_vm9 = vcmp.ge.f32.partialorder %v2080_v33, 0.0  ;;  %v2269_v35 = vmul.f32 0.01, %v2080_v33  ;;  %v2331_v43 = vsel %vm2203_vm7, %v2076_v27, %v2267_v32 }
 0x41f   : > { %v2332_v37 = vsel %vm2204_vm8, %v2078_v30, %v2268_v34 }
 0x420   : > { %v2385_v40 = vpack.c.bf16 %v2332_v37, %v2330_v36  ;;  %v2083_v42 = vpop.f32.mrb[56].mxu0  ;;  %v2333_v45 = vsel %vm2205_vm9, %v2080_v33, %v2269_v35 }
 0x421   : > { %v2084_v46 = vadd.f32 %v2083_v42, %v1732_v38  ;;  %v2085_v48 = vpop.f32.mrb[57].mxu0  ;;  %v2386_v49 = vpack.c.bf16 %v2333_v45, %v2331_v43 }
 0x422   : > { %v2086_v51 = vadd.f32 %v2085_v48, %v1732_v38  ;;  %v2087_v52 = vpop.f32.mrb[58].mxu0  ;;  %v1762_v38 = vpop.permute.xlu0 %1761 }
 0x423   : > { %v2270_v53 = vmul.f32 0.01, %v2084_v46  ;;  %v2088_v54 = vadd.f32 %v2087_v52, %v1737_v50  ;;  %v2089_v55 = vpop.f32.mrb[59].mxu0  ;;  %2452 = vmatprep.subr.bf16.mxu1 %v2386_v49  ;;  %vm2206_vm10 = vcmp.ge.f32.partialorder %v2084_v46, 0.0 }
 0x424   : > { %v2271_v56 = vmul.f32 0.01, %v2086_v51  ;;  %v2090_v57 = vadd.f32 %v2089_v55, %v1737_v50  ;;  %2453 = vmatpush1.bf16.msra.mxu1 %v2385_v40  ;;  %vm2207_vm11 = vcmp.ge.f32.partialorder %v2086_v51, 0.0  ;;  %v1767_v50 = vpop.permute.xlu1 %1766 }
 0x425   : > { %vm2208_vm12 = vcmp.ge.f32.partialorder %v2088_v54, 0.0  ;;  %v2272_v58 = vmul.f32 0.01, %v2088_v54  ;;  %v2334_v60 = vsel %vm2206_vm10, %v2084_v46, %v2270_v53 }
 0x426   : > { %vm2209_vm13 = vcmp.ge.f32.partialorder %v2090_v57, 0.0  ;;  %v2273_v59 = vmul.f32 0.01, %v2090_v57  ;;  %v2335_v3 = vsel %vm2207_vm11, %v2086_v51, %v2271_v56 }
 0x427   : > { %v2336_v61 = vsel %vm2208_vm12, %v2088_v54, %v2272_v58 }
 0x428   : > { %v2387_v63 = vpack.c.bf16 %v2336_v61, %v2334_v60  ;;  %v2093_v1 = vpop.f32.mrb[60].mxu0  ;;  %v2337_v4 = vsel %vm2209_vm13, %v2090_v57, %v2273_v59 }
 0x429   : > { %v2094_v0 = vadd.f32 %v2093_v1, %v1742_v62  ;;  %v2095_v5 = vpop.f32.mrb[61].mxu0  ;;  %v2388_v6 = vpack.c.bf16 %v2337_v4, %v2335_v3 }
 0x42a   : > { %v2096_v8 = vadd.f32 %v2095_v5, %v1742_v62  ;;  %v2097_v9 = vpop.f32.mrb[62].mxu0  ;;  %v1772_v62 = vpop.permute.xlu0 %1771 }
 0x42b   : > { %v2274_v10 = vmul.f32 0.01, %v2094_v0  ;;  %v2098_v11 = vadd.f32 %v2097_v9, %v1747_v7  ;;  %v2099_v13 = vpop.f32.mrb[63].mxu0  ;;  %2454 = vmatprep.subr.bf16.mxu1 %v2388_v6  ;;  %vm2210_vm14 = vcmp.ge.f32.partialorder %v2094_v0, 0.0 }
 0x42c   : > { %v2275_v14 = vmul.f32 0.01, %v2096_v8  ;;  %v2100_v15 = vadd.f32 %v2099_v13, %v1747_v7  ;;  %2455 = vmatpush1.bf16.msra.mxu1 %v2387_v63  ;;  %vm2211_vm15 = vcmp.ge.f32.partialorder %v2096_v8, 0.0  ;;  %v1777_v7 = vpop.permute.xlu1 %1776 }
 0x42d   : > { %vm2212_vm0 = vcmp.ge.f32.partialorder %v2098_v11, 0.0  ;;  %v2276_v16 = vmul.f32 0.01, %v2098_v11  ;;  %v2338_v18 = vsel %vm2210_vm14, %v2094_v0, %v2274_v10 }
 0x42e   : > { %vm2213_vm1 = vcmp.ge.f32.partialorder %v2100_v15, 0.0  ;;  %v2277_v17 = vmul.f32 0.01, %v2100_v15  ;;  %v2339_v21 = vsel %vm2211_vm15, %v2096_v8, %v2275_v14 }
 0x42f   : > { %v2340_v19 = vsel %vm2212_vm0, %v2098_v11, %v2276_v16 }
 0x430   : > { %v2389_v12 = vpack.c.bf16 %v2340_v19, %v2338_v18  ;;  %v2103_v20 = vpop.f32.mrb[64].mxu0  ;;  %v2341_v22 = vsel %vm2213_vm1, %v2100_v15, %v2277_v17 }
 0x431   : > { %v2104_v23 = vadd.f32 %v2103_v20, %v1752_v2  ;;  %v2105_v24 = vpop.f32.mrb[65].mxu0  ;;  %v2390_v25 = vpack.c.bf16 %v2341_v22, %v2339_v21 }
 0x432   : > { %v2106_v27 = vadd.f32 %v2105_v24, %v1752_v2  ;;  %v2107_v28 = vpop.f32.mrb[66].mxu0  ;;  %v1782_v2 = vpop.permute.xlu0 %1781 }
 0x433   : > { %v2278_v29 = vmul.f32 0.01, %v2104_v23  ;;  %v2108_v30 = vadd.f32 %v2107_v28, %v1757_v26  ;;  %v2109_v31 = vpop.f32.mrb[67].mxu0  ;;  %2456 = vmatprep.subr.bf16.mxu1 %v2390_v25  ;;  %vm2214_vm2 = vcmp.ge.f32.partialorder %v2104_v23, 0.0 }
 0x434   : > { %v2279_v32 = vmul.f32 0.01, %v2106_v27  ;;  %v2110_v33 = vadd.f32 %v2109_v31, %v1757_v26  ;;  %2457 = vmatpush1.bf16.msra.mxu1 %v2389_v12  ;;  %vm2215_vm3 = vcmp.ge.f32.partialorder %v2106_v27, 0.0  ;;  %v1787_v26 = vpop.permute.xlu1 %1786 }
 0x435   : > { %vm2216_vm4 = vcmp.ge.f32.partialorder %v2108_v30, 0.0  ;;  %v2280_v34 = vmul.f32 0.01, %v2108_v30  ;;  %v2342_v36 = vsel %vm2214_vm2, %v2104_v23, %v2278_v29 }
 0x436   : > { %vm2217_vm5 = vcmp.ge.f32.partialorder %v2110_v33, 0.0  ;;  %v2281_v35 = vmul.f32 0.01, %v2110_v33  ;;  %v2343_v43 = vsel %vm2215_vm3, %v2106_v27, %v2279_v32 }
 0x437   : > { %v2344_v37 = vsel %vm2216_vm4, %v2108_v30, %v2280_v34 }
 0x438   : > { %v2391_v40 = vpack.c.bf16 %v2344_v37, %v2342_v36  ;;  %v2113_v42 = vpop.f32.mrb[68].mxu0  ;;  %v2345_v45 = vsel %vm2217_vm5, %v2110_v33, %v2281_v35 }
 0x439   : > { %v2114_v46 = vadd.f32 %v2113_v42, %v1762_v38  ;;  %v2115_v48 = vpop.f32.mrb[69].mxu0  ;;  %v2392_v49 = vpack.c.bf16 %v2345_v45, %v2343_v43 }
 0x43a   : > { %v2116_v51 = vadd.f32 %v2115_v48, %v1762_v38  ;;  %v2117_v52 = vpop.f32.mrb[70].mxu0  ;;  %v1792_v38 = vpop.permute.xlu0 %1791 }
 0x43b   : > { %v2282_v53 = vmul.f32 0.01, %v2114_v46  ;;  %v2118_v54 = vadd.f32 %v2117_v52, %v1767_v50  ;;  %v2119_v55 = vpop.f32.mrb[71].mxu0  ;;  %2458 = vmatprep.subr.bf16.mxu1 %v2392_v49  ;;  %vm2218_vm6 = vcmp.ge.f32.partialorder %v2114_v46, 0.0 }
 0x43c   : > { %v2283_v56 = vmul.f32 0.01, %v2116_v51  ;;  %v2120_v57 = vadd.f32 %v2119_v55, %v1767_v50  ;;  %2459 = vmatpush1.bf16.msra.mxu1 %v2391_v40  ;;  %vm2219_vm7 = vcmp.ge.f32.partialorder %v2116_v51, 0.0  ;;  %v1797_v50 = vpop.permute.xlu1 %1796 }
 0x43d   : > { %vm2220_vm8 = vcmp.ge.f32.partialorder %v2118_v54, 0.0  ;;  %v2284_v58 = vmul.f32 0.01, %v2118_v54  ;;  %v2346_v60 = vsel %vm2218_vm6, %v2114_v46, %v2282_v53 }
 0x43e   : > { %vm2221_vm9 = vcmp.ge.f32.partialorder %v2120_v57, 0.0  ;;  %v2285_v59 = vmul.f32 0.01, %v2120_v57  ;;  %v2347_v3 = vsel %vm2219_vm7, %v2116_v51, %v2283_v56 }
 0x43f   : > { %v2348_v61 = vsel %vm2220_vm8, %v2118_v54, %v2284_v58 }
 0x440   : > { %v2393_v63 = vpack.c.bf16 %v2348_v61, %v2346_v60  ;;  %v2123_v1 = vpop.f32.mrb[72].mxu0  ;;  %v2349_v4 = vsel %vm2221_vm9, %v2120_v57, %v2285_v59 }
 0x441   : > { %v2124_v0 = vadd.f32 %v2123_v1, %v1772_v62  ;;  %v2125_v5 = vpop.f32.mrb[73].mxu0  ;;  %v2394_v6 = vpack.c.bf16 %v2349_v4, %v2347_v3 }
 0x442   : > { %v2126_v8 = vadd.f32 %v2125_v5, %v1772_v62  ;;  %v2127_v9 = vpop.f32.mrb[74].mxu0  ;;  %v1802_v62 = vpop.permute.xlu0 %1801 }
 0x443   : > { %v2286_v10 = vmul.f32 0.01, %v2124_v0  ;;  %v2128_v11 = vadd.f32 %v2127_v9, %v1777_v7  ;;  %v2129_v13 = vpop.f32.mrb[75].mxu0  ;;  %2460 = vmatprep.subr.bf16.mxu1 %v2394_v6  ;;  %vm2222_vm10 = vcmp.ge.f32.partialorder %v2124_v0, 0.0 }
 0x444   : > { %v2287_v14 = vmul.f32 0.01, %v2126_v8  ;;  %v2130_v15 = vadd.f32 %v2129_v13, %v1777_v7  ;;  %2461 = vmatpush1.bf16.msra.mxu1 %v2393_v63  ;;  %vm2223_vm11 = vcmp.ge.f32.partialorder %v2126_v8, 0.0  ;;  %v1807_v7 = vpop.permute.xlu1 %1806 }
 0x445   : > { %vm2224_vm12 = vcmp.ge.f32.partialorder %v2128_v11, 0.0  ;;  %v2288_v16 = vmul.f32 0.01, %v2128_v11  ;;  %v2350_v18 = vsel %vm2222_vm10, %v2124_v0, %v2286_v10 }
 0x446   : > { %vm2225_vm13 = vcmp.ge.f32.partialorder %v2130_v15, 0.0  ;;  %v2289_v17 = vmul.f32 0.01, %v2130_v15  ;;  %v2351_v21 = vsel %vm2223_vm11, %v2126_v8, %v2287_v14 }
 0x447   : > { %v2352_v19 = vsel %vm2224_vm12, %v2128_v11, %v2288_v16 }
 0x448   : > { %v2395_v12 = vpack.c.bf16 %v2352_v19, %v2350_v18  ;;  %v2133_v20 = vpop.f32.mrb[76].mxu0  ;;  %v2353_v22 = vsel %vm2225_vm13, %v2130_v15, %v2289_v17 }
 0x449   : > { %v2134_v23 = vadd.f32 %v2133_v20, %v1782_v2  ;;  %v2135_v24 = vpop.f32.mrb[77].mxu0  ;;  %v2396_v25 = vpack.c.bf16 %v2353_v22, %v2351_v21 }
 0x44a   : > { %v2136_v27 = vadd.f32 %v2135_v24, %v1782_v2  ;;  %v2137_v28 = vpop.f32.mrb[78].mxu0  ;;  %v1812_v2 = vpop.permute.xlu0 %1811 }
 0x44b   : > { %v2290_v29 = vmul.f32 0.01, %v2134_v23  ;;  %v2138_v30 = vadd.f32 %v2137_v28, %v1787_v26  ;;  %v2139_v31 = vpop.f32.mrb[79].mxu0  ;;  %2462 = vmatprep.subr.bf16.mxu1 %v2396_v25  ;;  %vm2226_vm14 = vcmp.ge.f32.partialorder %v2134_v23, 0.0 }
 0x44c   : > { %v2291_v32 = vmul.f32 0.01, %v2136_v27  ;;  %v2140_v33 = vadd.f32 %v2139_v31, %v1787_v26  ;;  %2463 = vmatpush1.bf16.msra.mxu1 %v2395_v12  ;;  %vm2227_vm15 = vcmp.ge.f32.partialorder %v2136_v27, 0.0  ;;  %v1817_v26 = vpop.permute.xlu1 %1816 }
 0x44d   : > { %vm2228_vm0 = vcmp.ge.f32.partialorder %v2138_v30, 0.0  ;;  %v2292_v34 = vmul.f32 0.01, %v2138_v30  ;;  %v2354_v36 = vsel %vm2226_vm14, %v2134_v23, %v2290_v29 }
 0x44e   : > { %vm2229_vm1 = vcmp.ge.f32.partialorder %v2140_v33, 0.0  ;;  %v2293_v35 = vmul.f32 0.01, %v2140_v33  ;;  %v2355_v43 = vsel %vm2227_vm15, %v2136_v27, %v2291_v32 }
 0x44f   : > { %v2356_v37 = vsel %vm2228_vm0, %v2138_v30, %v2292_v34 }
 0x450   : > { %v2397_v40 = vpack.c.bf16 %v2356_v37, %v2354_v36  ;;  %v2143_v42 = vpop.f32.mrb[80].mxu0  ;;  %v2357_v45 = vsel %vm2229_vm1, %v2140_v33, %v2293_v35 }
 0x451   : > { %v2144_v46 = vadd.f32 %v2143_v42, %v1792_v38  ;;  %v2145_v48 = vpop.f32.mrb[81].mxu0  ;;  %v2398_v49 = vpack.c.bf16 %v2357_v45, %v2355_v43 }
 0x452   : > { %v2146_v51 = vadd.f32 %v2145_v48, %v1792_v38  ;;  %v2147_v52 = vpop.f32.mrb[82].mxu0  ;;  %v1822_v38 = vpop.permute.xlu0 %1821 }
 0x453   : > { %v2294_v53 = vmul.f32 0.01, %v2144_v46  ;;  %v2148_v54 = vadd.f32 %v2147_v52, %v1797_v50  ;;  %v2149_v55 = vpop.f32.mrb[83].mxu0  ;;  %2464 = vmatprep.subr.bf16.mxu1 %v2398_v49  ;;  %vm2230_vm2 = vcmp.ge.f32.partialorder %v2144_v46, 0.0 }
 0x454   : > { %v2295_v56 = vmul.f32 0.01, %v2146_v51  ;;  %v2150_v57 = vadd.f32 %v2149_v55, %v1797_v50  ;;  %2465 = vmatpush1.bf16.msra.mxu1 %v2397_v40  ;;  %vm2231_vm3 = vcmp.ge.f32.partialorder %v2146_v51, 0.0  ;;  %v1827_v50 = vpop.permute.xlu1 %1826 }
 0x455   : > { %vm2232_vm4 = vcmp.ge.f32.partialorder %v2148_v54, 0.0  ;;  %v2296_v58 = vmul.f32 0.01, %v2148_v54  ;;  %v2358_v60 = vsel %vm2230_vm2, %v2144_v46, %v2294_v53  ;;  %vm2503_vm2 = vcmp.lt.s32.totalorder %v2413_v39, 256 }
 0x456   : > { %vm2233_vm5 = vcmp.ge.f32.partialorder %v2150_v57, 0.0  ;;  %v2297_v59 = vmul.f32 0.01, %v2150_v57  ;;  %v2359_v3 = vsel %vm2231_vm3, %v2146_v51, %v2295_v56 }
 0x457   : > { %v2360_v61 = vsel %vm2232_vm4, %v2148_v54, %v2296_v58 }
 0x458   : > { %v2399_v63 = vpack.c.bf16 %v2360_v61, %v2358_v60  ;;  %v2153_v1 = vpop.f32.mrb[84].mxu0  ;;  %v2361_v4 = vsel %vm2233_vm5, %v2150_v57, %v2297_v59 }
 0x459   : > { %v2154_v0 = vadd.f32 %v2153_v1, %v1802_v62  ;;  %v2155_v5 = vpop.f32.mrb[85].mxu0  ;;  %v2400_v6 = vpack.c.bf16 %v2361_v4, %v2359_v3  ;;  %v2432_v4 = vrot.slane %v3498_v47, %v3493_v44 }
 0x45a   : > { %v2156_v8 = vadd.f32 %v2155_v5, %v1802_v62  ;;  %v2157_v9 = vpop.f32.mrb[86].mxu0  ;;  %v2411_v5 = vpop.permute.xlu0 %2410 }
 0x45b   : > { %v2298_v10 = vmul.f32 0.01, %v2154_v0  ;;  %v2158_v11 = vadd.f32 %v2157_v9, %v1807_v7  ;;  %v2159_v13 = vpop.f32.mrb[87].mxu0  ;;  %2466 = vmatprep.subr.bf16.mxu1 %v2400_v6  ;;  %vm2234_vm6 = vcmp.ge.f32.partialorder %v2154_v0, 0.0 }
 0x45c   : > { %v2299_v14 = vmul.f32 0.01, %v2156_v8  ;;  %v2160_v15 = vadd.f32 %v2159_v13, %v1807_v7  ;;  %2467 = vmatpush1.bf16.msra.mxu1 %v2399_v63  ;;  %vm2235_vm7 = vcmp.ge.f32.partialorder %v2156_v8, 0.0 }
 0x45d   : > { %vm2236_vm8 = vcmp.ge.f32.partialorder %v2158_v11, 0.0  ;;  %v2300_v16 = vmul.f32 0.01, %v2158_v11  ;;  %v2362_v18 = vsel %vm2234_vm6, %v2154_v0, %v2298_v10  ;;  %v2415_v0 = vsub.s32 0, %v3490_v41 }
 0x45e   : > { %vm2237_vm9 = vcmp.ge.f32.partialorder %v2160_v15, 0.0  ;;  %v2301_v17 = vmul.f32 0.01, %v2160_v15  ;;  %v2363_v21 = vsel %vm2235_vm7, %v2156_v8, %v2299_v14 }
 0x45f   : > { %v2364_v19 = vsel %vm2236_vm8, %v2158_v11, %v2300_v16  ;;  %v2416_v6 = vrot.slane %v2411_v5, %v2415_v0 }
 0x460   : > { %v2401_v12 = vpack.c.bf16 %v2364_v19, %v2362_v18  ;;  %v2163_v20 = vpop.f32.mrb[88].mxu0  ;;  %v2365_v22 = vsel %vm2237_vm9, %v2160_v15, %v2301_v17 }
 0x461   : > { %v2164_v23 = vadd.f32 %v2163_v20, %v1812_v2  ;;  %v2165_v24 = vpop.f32.mrb[89].mxu0  ;;  %v2402_v25 = vpack.c.bf16 %v2365_v22, %v2363_v21 }
 0x462   : > { %v2166_v27 = vadd.f32 %v2165_v24, %v1812_v2  ;;  %v2167_v28 = vpop.f32.mrb[90].mxu0 }
 0x463   : > { %v2302_v29 = vmul.f32 0.01, %v2164_v23  ;;  %v2168_v30 = vadd.f32 %v2167_v28, %v1817_v26  ;;  %v2169_v31 = vpop.f32.mrb[91].mxu0  ;;  %2468 = vmatprep.subr.bf16.mxu1 %v2402_v25  ;;  %vm2238_vm10 = vcmp.ge.f32.partialorder %v2164_v23, 0.0 }
 0x464   : > { %v2303_v32 = vmul.f32 0.01, %v2166_v27  ;;  %v2170_v33 = vadd.f32 %v2169_v31, %v1817_v26  ;;  %2469 = vmatpush1.bf16.msra.mxu1 %v2401_v12  ;;  %vm2239_vm11 = vcmp.ge.f32.partialorder %v2166_v27, 0.0 }
 0x465   : > { %vm2240_vm12 = vcmp.ge.f32.partialorder %v2168_v30, 0.0  ;;  %v2304_v34 = vmul.f32 0.01, %v2168_v30  ;;  %v2366_v36 = vsel %vm2238_vm10, %v2164_v23, %v2302_v29 }
 0x466   : > { %vm2241_vm13 = vcmp.ge.f32.partialorder %v2170_v33, 0.0  ;;  %v2305_v35 = vmul.f32 0.01, %v2170_v33  ;;  %v2367_v43 = vsel %vm2239_vm11, %v2166_v27, %v2303_v32 }
 0x467   : > { %v2368_v37 = vsel %vm2240_vm12, %v2168_v30, %v2304_v34 }
 0x468   : > { %v2403_v40 = vpack.c.bf16 %v2368_v37, %v2366_v36  ;;  %v2173_v42 = vpop.f32.mrb[92].mxu0  ;;  %v2369_v45 = vsel %vm2241_vm13, %v2170_v33, %v2305_v35 }
 0x469   : > { %v2174_v46 = vadd.f32 %v2173_v42, %v1822_v38  ;;  %v2175_v48 = vpop.f32.mrb[93].mxu0  ;;  %v2404_v49 = vpack.c.bf16 %v2369_v45, %v2367_v43 }
 0x46a   : > { %v2176_v51 = vadd.f32 %v2175_v48, %v1822_v38  ;;  %v2177_v52 = vpop.f32.mrb[94].mxu0 }
 0x46b   : > { %v2306_v53 = vmul.f32 0.01, %v2174_v46  ;;  %v2178_v54 = vadd.f32 %v2177_v52, %v1827_v50  ;;  %v2179_v55 = vpop.f32.mrb[95].mxu0  ;;  %2470 = vmatprep.subr.bf16.mxu1 %v2404_v49  ;;  %vm2242_vm14 = vcmp.ge.f32.partialorder %v2174_v46, 0.0 }
 0x46c   : > { %v2307_v56 = vmul.f32 0.01, %v2176_v51  ;;  %v2180_v57 = vadd.f32 %v2179_v55, %v1827_v50  ;;  %2471 = vmatpush1.bf16.msra.mxu1 %v2403_v40  ;;  %vm2243_vm15 = vcmp.ge.f32.partialorder %v2176_v51, 0.0 }
 0x46d   : > { %vm2244_vm0 = vcmp.ge.f32.partialorder %v2178_v54, 0.0  ;;  %v2308_v58 = vmul.f32 0.01, %v2178_v54  ;;  %v2370_v60 = vsel %vm2242_vm14, %v2174_v46, %v2306_v53 }
 0x46e   : > { %vm2245_vm1 = vcmp.ge.f32.partialorder %v2180_v57, 0.0  ;;  %v2309_v59 = vmul.f32 0.01, %v2180_v57  ;;  %v2371_v63 = vsel %vm2243_vm15, %v2176_v51, %v2307_v56 }
 0x46f   : > { %v2372_v61 = vsel %vm2244_vm0, %v2178_v54, %v2308_v58 }
 0x470   : > { %v2405_v62 = vpack.c.bf16 %v2372_v61, %v2370_v60  ;;  %v2373_v1 = vsel %vm2245_vm1, %v2180_v57, %v2309_v59 }
 0x471   : > { %v2406_v3 = vpack.c.bf16 %v2373_v1, %v2371_v63 }
 0x473   : > { %2472 = vmatprep.subr.bf16.mxu1 %v2406_v3 }
 0x474   : > { %2473 = vmatpush1.bf16.msra.mxu1 %v2405_v62 }
 0x477   : > { %2475 = vmatmul.mubr.bf16.vlgmr.msra.gmra.mrb[64].mxu1 %v2432_v4 }
 0x54a   : > { %v2476_v7 = vpop.f32.mrb[64].mxu1 }
 0x54b   : > { %v2477_v8 = vadd.f32 %v2476_v7, %v2416_v6  ;;  %v2478_v9 = vpop.f32.mrb[65].mxu1 }
 0x54c   : > { %v2479_v10 = vadd.f32 %v2478_v9, %v2416_v6  ;;  %v2480_v11 = vpop.f32.mrb[66].mxu1 }
 0x54d   : > { %v2481_v13 = vpop.f32.mrb[67].mxu1 }
 0x54e   : > { %v2485_v14 = vcombine.low %v2477_v8, %v2479_v10  ;;  %2513 = sbr.rel (!%p2975_p5) target bundleno = 1392 (0x570), region = 60 }
 0x550   : > { %v2492_v15 = vrot.slane %v2485_v14, %v3493_v44 }
 0x552   : > { %v2499_v47 = vrot.slane %v2492_v15, %v3493_v44 }
 0x554   : > { %2505 = vst.msk [vmem:[%s340_s30] sm:$0x3] %vm2503_vm2, %v2499_v47 }
 0x555   : > { %s3581_s10 = smov (!%p2516_p11, %s2515_s10), 2 }
 0x556   : > { %s3515_s18 = sshll.u32 %s3581_s10, 4 }
 0x557   : > { %s2520_s23 = ssub.s32 32, %s3515_s18 }
 0x558   : > { %2521 = vsyncadd %s3510_s15, %s2520_s23  ;;  %p2661_p12 = scmp.ne.s32.totalorder %s3515_s18, 0  ;;  %s3524_s20 = scalar_lea.hbm %s3573_s9, %s2986_s22 }
 0x559   : > { %s2526_s26 = sshll.u32 %s340_s30, 4  ;;  %s2883_s27 = smov [#allocation3]   ;;  %s2527_s26 = int_to_ptr.vmem [resolvable:$true] %s2526_s26 }
 0x55a   : > { %s2817_s8 = scalar_lea.vmem %s2527_s26, %s3515_s18  ;;  %s2821_s28 = sshll.u32 %s2883_s27, 4  ;;  %s2822_s28 = int_to_ptr.vmem [resolvable:$false] %s2821_s28 }
 0x55b   : > { %p2818_p13 = scmp.ne.s32.totalorder %s2527_s26, %s2817_s8  ;;  %s2823_s29 = scalar_lea.vmem %s2822_s28, 64 }
 0x55c   : > { %p2824_p2 = scmp.lt.s32.totalorder %s2527_s26, %s2822_s28  ;;  %p2825_p3 = scmp.lt.s32.totalorder %s2823_s29, %s2817_s8 }
 0x55d   : > { %p2819_p0 = pnand %p2818_p13, %p2661_p12 }
 0x55e   : > { %p2826_p4 = por %p2825_p3, %p2824_p2 }
 0x55f   : > { %p2820_p1 = pneg %p2819_p0 }
 0x561   : > { %p2827_p5 = pnand %p2826_p4, %p2820_p1 }
 0x563   : > { %2830 = shalt.err (!%p2827_p5)
}
 0x564   : > { %s2831_s22 = scalar_lea.hbm %s3524_s20, %s3515_s18  ;;  %s2835_s10 = scalar_lea.hbm %s3573_s9, 48 }
 0x565   : > { %p2832_p7 = scmp.ne.s32.totalorder %s3524_s20, %s2831_s22  ;;  %p2836_p10 = scmp.lt.u32.totalorder %s3524_s20, %s3573_s9 }
 0x566   : > { %p2837_p11 = scmp.lt.u32.totalorder %s2835_s10, %s2831_s22  ;;  %p2839_p0 = scmp.lt.u32.totalorder %s2831_s22, %s3524_s20 }
 0x567   : > { %p2833_p8 = pnand %p2832_p7, %p2661_p12 }
 0x568   : > { %p2838_p13 = por %p2837_p11, %p2836_p10 }
 0x569   : > { %p2834_p9 = pneg %p2833_p8 }
 0x56a   : > { %p2840_p1 = por %p2839_p0, %p2838_p13 }
 0x56c   : > { %p2841_p2 = pnand %p2840_p1, %p2834_p9 }
 0x56e   : > { %2844 = shalt.err (!%p2841_p2)
}
 0x56f   : > { %2529 = dma.vmem_to_hbm [thread:$0]  (%p2661_p12), %s2527_s26, %s3515_s18, %s3524_s20, %s3510_s15  }
 0x570 PF: > { %p2671_p3 = scmp.ge.s32.totalorder %s2879_s14, 2  ;;  %s2538_s25 = sand.u32 1, %s2867_s11  }
 0x571   : > { %s2539_s8 = scalar_lea.sflag [#allocation4], %s2538_s25 }
 0x572   : > { %p2668_p4 = pnand %p2671_p3, %p2979_p6 }
 0x574   : > { %2862 = dma.done.wait (!%p2668_p4), %s2539_s8, 32  }
 0x575   : > { %2864 = vsyncadd (!%p2668_p4), %s2539_s8, 4294967264  ;;  %p21_p5 = scmp.ge.s32.totalorder %s2962_s16, 4   ;;  %s3576_s11 = smov %s2871_s12 }
 0x576   : > { %s3577_s12 = smov %s2875_s13  ;;  %s3578_s13 = smov %s2973_s19 }
 0x577   : > { %s3579_s14 = smov %s2962_s16  ;;  %23 = sbr.rel (!%p21_p5) target bundleno = 6 (0x6), region = 91 }
 0x57e   :  { %2544 = vsyncpa [#allocation4], 1 }
 0x57f   :  { %2546 = vsyncpa [#allocation4 + $0x1], 1 }

</bundles_post_ra>
